<compile_context>
chip_gen: v6e
topology: v6e:2x2x1
jax: 0.10.0
libtpu: 0.0.40
codegen_flags: <defaults>
</compile_context>

<pallas_src>
import functools

import jax
import jax.numpy as jnp
from jax.experimental import pallas as pl
from jax.experimental.pallas import tpu as pltpu


def sa_layer_kernel(tq, x_ref, wq_ref, wv_ref, bv_ref, wt_ref, bt_ref, o_ref,
                    q_sc, v_sc, num_sc, col_sc):
    j = pl.program_id(1)
    last = pl.num_programs(1) - 1
    cn_inv = 1.0 / float(x_ref.shape[1] * x_ref.shape[2])

    # ---- prologue (once per batch element): 1x1 convs + accumulator init ----
    @pl.when(j == 0)
    def _prologue():
        x = x_ref[0]                                            # (C, N) f32
        # shared q/k projection: kept f32 (feeds the softmax exponent)
        q_sc[...] = jnp.dot(wq_ref[...], x,
                            preferred_element_type=jnp.float32)
        # v projection: bf16 MXU operands, f32 accumulation, f32 bias add
        v = jnp.dot(wv_ref[...], x.astype(jnp.bfloat16),
                    preferred_element_type=jnp.float32) + bv_ref[...]
        v_sc[...] = v.astype(jnp.bfloat16)
        num_sc[...] = jnp.zeros_like(num_sc)
        col_sc[...] = jnp.zeros_like(col_sc)

    # ---- streamed attention over query-row blocks (no N x N live array) ----
    off = pl.multiple_of(j * tq, tq)
    q_blk = q_sc[:, pl.ds(off, tq)]                             # (C/4, TQ) f32
    # energy[m, n] = sum_d q[d, off+m] * q[d, n]  (MXU-native transposed LHS)
    energy = jax.lax.dot_general(
        q_blk, q_sc[...],
        dimension_numbers=(((0,), (0,)), ((), ())),
        preferred_element_type=jnp.float32)                     # (TQ, N) f32

    m = jnp.max(energy, axis=-1, keepdims=True)
    e = jnp.exp(energy - m)
    inv_den = pl.reciprocal(jnp.sum(e, axis=-1, keepdims=True), approx=True)
    attn = e * inv_den                                          # row softmax, f32

    # attention.sum(dim=1) in the PyTorch module == column sums over rows m
    col_sc[...] += jnp.sum(attn, axis=0, keepdims=True)         # (1, N)
    # un-renormalized x_r numerator: v[:, block] @ attn_block  (bf16 MXU, f32 acc)
    v_blk = v_sc[:, pl.ds(off, tq)]                             # (C, TQ) bf16
    num_sc[...] += jnp.dot(v_blk, attn.astype(jnp.bfloat16),
                           preferred_element_type=jnp.float32)  # (C, N) f32

    # ---- epilogue: column renorm, trans_conv, residual, instance norm ----
    @pl.when(j == last)
    def _epilogue():
        inv_col = pl.reciprocal(1e-9 + col_sc[...], approx=True)    # (1, N)
        x_r = num_sc[...] * inv_col                                 # (C, N) f32
        t = jnp.dot(wt_ref[...], x_r.astype(jnp.bfloat16),
                    preferred_element_type=jnp.float32) + bt_ref[...]
        y = t + x_ref[0]
        # fused single-pass instance-norm statistics over (C, N)
        mean = jnp.sum(y) * cn_inv
        mean_sq = jnp.sum(y * y) * cn_inv
        var = mean_sq - mean * mean
        o_ref[0] = (y - mean) * jax.lax.rsqrt(var + 1e-5)


def sa_layer(x, wq, wv, bv, wt, bt):
    B, C, N = x.shape
    C4 = wq.shape[0]

    # query-row tile: 128 rows (MXU / lane granularity) when N allows, else N
    tq = 128 if (N % 128 == 0 and N > 128) else N
    nb = N // tq

    # bf16 MXU operands for the heavy matmuls (f32 accumulation in-kernel)
    wv_b = wv.astype(jnp.bfloat16)
    wt_b = wt.astype(jnp.bfloat16)

    # explicit scoped-VMEM sizing: resident per-b state + per-step tiles + headroom
    f32b, bf16b = 4, 2
    est = (
        2 * 2 * C * N * f32b                                    # x / out (double-buffered)
        + C4 * C * f32b + 2 * C * C * bf16b + 2 * C * f32b      # weights / biases
        + C4 * N * f32b + C * N * bf16b + C * N * f32b + 8 * N * f32b  # scratch
        + tq * N * (2 * f32b + bf16b)                           # energy / softmax / attn tile
        + 2 * C * N * f32b                                      # epilogue temps (x_r, y)
    )
    vmem_limit = min(max(int(est * 1.5) + (4 << 20), 32 << 20), 96 << 20)

    kernel = functools.partial(sa_layer_kernel, tq)
    return pl.pallas_call(
        kernel,
        out_shape=jax.ShapeDtypeStruct((B, C, N), jnp.float32),
        grid_spec=pltpu.PrefetchScalarGridSpec(
            num_scalar_prefetch=0,
            grid=(B, nb),
            in_specs=[
                pl.BlockSpec((1, C, N), lambda b, j: (b, 0, 0)),  # x (resident over j)
                pl.BlockSpec((C4, C), lambda b, j: (0, 0)),       # wq (f32, shared q/k)
                pl.BlockSpec((C, C), lambda b, j: (0, 0)),        # wv (bf16)
                pl.BlockSpec((C, 1), lambda b, j: (0, 0)),        # bv
                pl.BlockSpec((C, C), lambda b, j: (0, 0)),        # wt (bf16)
                pl.BlockSpec((C, 1), lambda b, j: (0, 0)),        # bt
            ],
            out_specs=pl.BlockSpec((1, C, N), lambda b, j: (b, 0, 0)),
            scratch_shapes=[
                pltpu.VMEM((C4, N), jnp.float32),   # q (shared q/k projection)
                pltpu.VMEM((C, N), jnp.bfloat16),   # v projection
                pltpu.VMEM((C, N), jnp.float32),    # x_r numerator accumulator
                pltpu.VMEM((1, N), jnp.float32),    # attention column sums
            ],
        ),
        compiler_params=pltpu.CompilerParams(
            dimension_semantics=("parallel", "arbitrary"),
            vmem_limit_bytes=vmem_limit,
        ),
    )(x, wq, wv_b, bv, wt_b, bt)


def sa_layer_ref(x, wq, wv, bv, wt, bt):
    """Plain-JAX f32 reference mirroring the PyTorch forward."""
    q = jnp.einsum("dc,bcn->bdn", wq, x)                      # (B, C//4, N)
    energy = jnp.einsum("bdm,bdn->bmn", q, q)                 # (B, N, N)
    attn = jax.nn.softmax(energy, axis=-1)
    attn = attn / (1e-9 + jnp.sum(attn, axis=1, keepdims=True))
    v = jnp.einsum("dc,bcn->bdn", wv, x) + bv[None, :, :]
    x_r = jnp.einsum("bcm,bmn->bcn", v, attn)
    t = jnp.einsum("dc,bcn->bdn", wt, x_r) + bt[None, :, :]
    y = t + x
    mean = jnp.mean(y, axis=(1, 2), keepdims=True)
    var = jnp.mean((y - mean) ** 2, axis=(1, 2), keepdims=True)
    return (y - mean) * jax.lax.rsqrt(var + 1e-5)


if __name__ == "__main__":
    B, C, N = 2, 32, 256        # N=256 -> 2 query-row blocks: exercises streaming
    C4 = C // 4

    key = jax.random.PRNGKey(0)
    kx, kq, kv, kbv, kt, kbt = jax.random.split(key, 6)

    x = jax.random.normal(kx, (B, C, N), dtype=jnp.float32)
    wq = jax.random.normal(kq, (C4, C), dtype=jnp.float32) * (1.0 / C) ** 0.5
    wv = jax.random.normal(kv, (C, C), dtype=jnp.float32) * (1.0 / C) ** 0.5
    bv = jax.random.normal(kbv, (C, 1), dtype=jnp.float32) * 0.1
    wt = jax.random.normal(kt, (C, C), dtype=jnp.float32) * (1.0 / C) ** 0.5
    bt = jax.random.normal(kbt, (C, 1), dtype=jnp.float32) * 0.1

    out = jax.block_until_ready(sa_layer(x, wq, wv, bv, wt, bt))
    ref = jax.block_until_ready(sa_layer_ref(x, wq, wv, bv, wt, bt))

    assert out.shape == (B, C, N)
    max_err = float(jnp.max(jnp.abs(out - ref)))
    assert jnp.allclose(out, ref, atol=1e-2, rtol=1e-2), f"max|err|={max_err}"

    print("KERNEL_OK")
</pallas_src>

<mosaic_0001>
module attributes {stable_mosaic.version = 11 : i64} {
  func.func @sa_layer_kernel(%arg0: i32, %arg1: i32, %arg2: memref<1x32x256xf32, #tpu.memory_space<vmem>>, %arg3: memref<8x32xf32, #tpu.memory_space<vmem>>, %arg4: memref<32x32xbf16, #tpu.memory_space<vmem>>, %arg5: memref<32x1xf32, #tpu.memory_space<vmem>>, %arg6: memref<32x32xbf16, #tpu.memory_space<vmem>>, %arg7: memref<32x1xf32, #tpu.memory_space<vmem>>, %arg8: memref<1x32x256xf32, #tpu.memory_space<vmem>>, %arg9: memref<8x256xf32, #tpu.memory_space<vmem>>, %arg10: memref<32x256xbf16, #tpu.memory_space<vmem>>, %arg11: memref<32x256xf32, #tpu.memory_space<vmem>>, %arg12: memref<1x256xf32, #tpu.memory_space<vmem>>) attributes {dimension_semantics = [#tpu.dimension_semantics<parallel>, #tpu.dimension_semantics<arbitrary>], iteration_bounds = array<i64: 2, 2>, scalar_prefetch = 0 : i64, scratch_operands = 4 : i64, tpu.core_type = #tpu.core_type<tc>, window_params = [{transform_indices = @transform_0, window_bounds = array<i64: 1, 32, 256>}, {pipeline_mode = #tpu.pipeline_mode<synchronous>, transform_indices = @transform_1, window_bounds = array<i64: 8, 32>}, {pipeline_mode = #tpu.pipeline_mode<synchronous>, transform_indices = @transform_2, window_bounds = array<i64: 32, 32>}, {pipeline_mode = #tpu.pipeline_mode<synchronous>, transform_indices = @transform_3, window_bounds = array<i64: 32, 1>}, {pipeline_mode = #tpu.pipeline_mode<synchronous>, transform_indices = @transform_4, window_bounds = array<i64: 32, 32>}, {pipeline_mode = #tpu.pipeline_mode<synchronous>, transform_indices = @transform_5, window_bounds = array<i64: 32, 1>}, {transform_indices = @transform_6, window_bounds = array<i64: 1, 32, 256>}]} {
    %c0_i32 = arith.constant 0 : i32
    %0 = arith.cmpi eq, %arg1, %c0_i32 : i32
    %1 = arith.extui %0 : i1 to i32
    %c0_i32_0 = arith.constant 0 : i32
    %2 = arith.cmpi ne, %1, %c0_i32_0 : i32
    scf.if %2 {
      %c0_17 = arith.constant 0 : index
      %c0_18 = arith.constant 0 : index
      %c0_19 = arith.constant 0 : index
      %34 = vector.load %arg2[%c0_17, %c0_18, %c0_19] : memref<1x32x256xf32, #tpu.memory_space<vmem>>, vector<1x32x256xf32>
      %35 = vector.shape_cast %34 : vector<1x32x256xf32> to vector<32x256xf32>
      %c0_20 = arith.constant 0 : index
      %c0_21 = arith.constant 0 : index
      %36 = vector.load %arg3[%c0_20, %c0_21] : memref<8x32xf32, #tpu.memory_space<vmem>>, vector<8x32xf32>
      %cst_22 = arith.constant dense<0.000000e+00> : vector<8x256xf32>
      %37 = tpu.matmul %36, %35, %cst_22 {dimension_numbers = #tpu.dot_dimension_numbers<[1], [0], [0], [1], [0, 0, 1, 1], [], []>} : vector<8x32xf32>, vector<32x256xf32>, vector<8x256xf32> -> vector<8x256xf32>
      %c0_23 = arith.constant 0 : index
      %c0_24 = arith.constant 0 : index
      %38 = vector.load %arg9[%c0_23, %c0_24] : memref<8x256xf32, #tpu.memory_space<vmem>>, vector<8x256xf32>
      tpu.vector_store %arg9[%c0_23, %c0_24], %37 {strides = array<i32>} : memref<8x256xf32, #tpu.memory_space<vmem>>, vector<8x256xf32>,
      %c0_25 = arith.constant 0 : index
      %c0_26 = arith.constant 0 : index
      %39 = vector.load %arg4[%c0_25, %c0_26] : memref<32x32xbf16, #tpu.memory_space<vmem>>, vector<32x32xbf16>
      %40 = arith.truncf %35 : vector<32x256xf32> to vector<32x256xbf16>
      %cst_27 = arith.constant dense<0.000000e+00> : vector<32x256xf32>
      %41 = tpu.matmul %39, %40, %cst_27 {dimension_numbers = #tpu.dot_dimension_numbers<[1], [0], [0], [1], [0, 0, 1, 1], [], []>} : vector<32x32xbf16>, vector<32x256xbf16>, vector<32x256xf32> -> vector<32x256xf32>
      %c0_28 = arith.constant 0 : index
      %c0_29 = arith.constant 0 : index
      %42 = vector.load %arg5[%c0_28, %c0_29] : memref<32x1xf32, #tpu.memory_space<vmem>>, vector<32x1xf32>
      %43 = vector.broadcast %42 : vector<32x1xf32> to vector<32x256xf32>
      %44 = arith.addf %41, %43 : vector<32x256xf32>
      %45 = arith.truncf %44 : vector<32x256xf32> to vector<32x256xbf16>
      %c0_30 = arith.constant 0 : index
      %c0_31 = arith.constant 0 : index
      %46 = vector.load %arg10[%c0_30, %c0_31] : memref<32x256xbf16, #tpu.memory_space<vmem>>, vector<32x256xbf16>
      tpu.vector_store %arg10[%c0_30, %c0_31], %45 {strides = array<i32>} : memref<32x256xbf16, #tpu.memory_space<vmem>>, vector<32x256xbf16>,
      %cst_32 = arith.constant 0.000000e+00 : f32
      %47 = vector.broadcast %cst_32 : f32 to vector<32x256xf32>
      %c0_33 = arith.constant 0 : index
      %c0_34 = arith.constant 0 : index
      %48 = vector.load %arg11[%c0_33, %c0_34] : memref<32x256xf32, #tpu.memory_space<vmem>>, vector<32x256xf32>
      tpu.vector_store %arg11[%c0_33, %c0_34], %47 {strides = array<i32>} : memref<32x256xf32, #tpu.memory_space<vmem>>, vector<32x256xf32>,
      %cst_35 = arith.constant 0.000000e+00 : f32
      %49 = vector.broadcast %cst_35 : f32 to vector<1x256xf32>
      %c0_36 = arith.constant 0 : index
      %c0_37 = arith.constant 0 : index
      %50 = vector.load %arg12[%c0_36, %c0_37] : memref<1x256xf32, #tpu.memory_space<vmem>>, vector<1x256xf32>
      tpu.vector_store %arg12[%c0_36, %c0_37], %49 {strides = array<i32>} : memref<1x256xf32, #tpu.memory_space<vmem>>, vector<1x256xf32>,
    } else {
    }
    %c128_i32 = arith.constant 128 : i32
    %3 = arith.muli %arg1, %c128_i32 : i32
    %4 = tpu.assume_multiple %3, 128 : i32
    %c0 = arith.constant 0 : index
    %5 = arith.index_cast %4 : i32 to index
    %6 = vector.load %arg9[%c0, %5] : memref<8x256xf32, #tpu.memory_space<vmem>>, vector<8x128xf32>
    %c0_1 = arith.constant 0 : index
    %c0_2 = arith.constant 0 : index
    %7 = vector.load %arg9[%c0_1, %c0_2] : memref<8x256xf32, #tpu.memory_space<vmem>>, vector<8x256xf32>
    %cst = arith.constant dense<0.000000e+00> : vector<128x256xf32>
    %8 = tpu.matmul %6, %7, %cst {dimension_numbers = #tpu.dot_dimension_numbers<[0], [0], [1], [1], [0, 1, 1, 1], [], []>} : vector<8x128xf32>, vector<8x256xf32>, vector<128x256xf32> -> vector<128x256xf32>
    %cst_3 = arith.constant dense<0xFF800000> : vector<128xf32>
    %9 = vector.multi_reduction <maximumf>, %8, %cst_3 [1] : vector<128x256xf32> to vector<128xf32>
    %10 = vector.shape_cast %9 : vector<128xf32> to vector<128x1xf32>
    %11 = vector.broadcast %10 : vector<128x1xf32> to vector<128x256xf32>
    %12 = arith.subf %8, %11 : vector<128x256xf32>
    %13 = math.exp %12 : vector<128x256xf32>
    %cst_4 = arith.constant dense<0.000000e+00> : vector<128xf32>
    %14 = vector.multi_reduction <add>, %13, %cst_4 [1] : vector<128x256xf32> to vector<128xf32>
    %15 = vector.shape_cast %14 : vector<128xf32> to vector<128x1xf32>
    %16 = tpu.reciprocal %15 {approx = true} : vector<128x1xf32> -> vector<128x1xf32>
    %17 = vector.broadcast %16 : vector<128x1xf32> to vector<128x256xf32>
    %18 = arith.mulf %13, %17 : vector<128x256xf32>
    %c0_5 = arith.constant 0 : index
    %c0_6 = arith.constant 0 : index
    %19 = vector.load %arg12[%c0_5, %c0_6] : memref<1x256xf32, #tpu.memory_space<vmem>>, vector<1x256xf32>
    %cst_7 = arith.constant dense<0.000000e+00> : vector<256xf32>
    %20 = vector.multi_reduction <add>, %18, %cst_7 [0] : vector<128x256xf32> to vector<256xf32>
    %21 = vector.shape_cast %20 : vector<256xf32> to vector<1x256xf32>
    %22 = arith.addf %19, %21 : vector<1x256xf32>
    %c0_8 = arith.constant 0 : index
    %c0_9 = arith.constant 0 : index
    %23 = vector.load %arg12[%c0_8, %c0_9] : memref<1x256xf32, #tpu.memory_space<vmem>>, vector<1x256xf32>
    tpu.vector_store %arg12[%c0_8, %c0_9], %22 {strides = array<i32>} : memref<1x256xf32, #tpu.memory_space<vmem>>, vector<1x256xf32>,
    %c0_10 = arith.constant 0 : index
    %24 = arith.index_cast %4 : i32 to index
    %25 = vector.load %arg10[%c0_10, %24] : memref<32x256xbf16, #tpu.memory_space<vmem>>, vector<32x128xbf16>
    %c0_11 = arith.constant 0 : index
    %c0_12 = arith.constant 0 : index
    %26 = vector.load %arg11[%c0_11, %c0_12] : memref<32x256xf32, #tpu.memory_space<vmem>>, vector<32x256xf32>
    %27 = arith.truncf %18 : vector<128x256xf32> to vector<128x256xbf16>
    %cst_13 = arith.constant dense<0.000000e+00> : vector<32x256xf32>
    %28 = tpu.matmul %25, %27, %cst_13 {dimension_numbers = #tpu.dot_dimension_numbers<[1], [0], [0], [1], [0, 0, 1, 1], [], []>} : vector<32x128xbf16>, vector<128x256xbf16>, vector<32x256xf32> -> vector<32x256xf32>
    %29 = arith.addf %26, %28 : vector<32x256xf32>
    %c0_14 = arith.constant 0 : index
    %c0_15 = arith.constant 0 : index
    %30 = vector.load %arg11[%c0_14, %c0_15] : memref<32x256xf32, #tpu.memory_space<vmem>>, vector<32x256xf32>
    tpu.vector_store %arg11[%c0_14, %c0_15], %29 {strides = array<i32>} : memref<32x256xf32, #tpu.memory_space<vmem>>, vector<32x256xf32>,
    %c1_i32 = arith.constant 1 : i32
    %31 = arith.cmpi eq, %arg1, %c1_i32 : i32
    %32 = arith.extui %31 : i1 to i32
    %c0_i32_16 = arith.constant 0 : i32
    %33 = arith.cmpi ne, %32, %c0_i32_16 : i32
    scf.if %33 {
      %c0_17 = arith.constant 0 : index
      %c0_18 = arith.constant 0 : index
      %34 = vector.load %arg12[%c0_17, %c0_18] : memref<1x256xf32, #tpu.memory_space<vmem>>, vector<1x256xf32>
      %cst_19 = arith.constant 9.99999971E-10 : f32
      %35 = vector.broadcast %cst_19 : f32 to vector<1x256xf32>
      %36 = arith.addf %35, %34 : vector<1x256xf32>
      %37 = tpu.reciprocal %36 {approx = true} : vector<1x256xf32> -> vector<1x256xf32>
      %c0_20 = arith.constant 0 : index
      %c0_21 = arith.constant 0 : index
      %38 = vector.load %arg11[%c0_20, %c0_21] : memref<32x256xf32, #tpu.memory_space<vmem>>, vector<32x256xf32>
      %39 = vector.broadcast %37 : vector<1x256xf32> to vector<32x256xf32>
      %40 = arith.mulf %38, %39 : vector<32x256xf32>
      %c0_22 = arith.constant 0 : index
      %c0_23 = arith.constant 0 : index
      %41 = vector.load %arg6[%c0_22, %c0_23] : memref<32x32xbf16, #tpu.memory_space<vmem>>, vector<32x32xbf16>
      %42 = arith.truncf %40 : vector<32x256xf32> to vector<32x256xbf16>
      %cst_24 = arith.constant dense<0.000000e+00> : vector<32x256xf32>
      %43 = tpu.matmul %41, %42, %cst_24 {dimension_numbers = #tpu.dot_dimension_numbers<[1], [0], [0], [1], [0, 0, 1, 1], [], []>} : vector<32x32xbf16>, vector<32x256xbf16>, vector<32x256xf32> -> vector<32x256xf32>
      %c0_25 = arith.constant 0 : index
      %c0_26 = arith.constant 0 : index
      %44 = vector.load %arg7[%c0_25, %c0_26] : memref<32x1xf32, #tpu.memory_space<vmem>>, vector<32x1xf32>
      %45 = vector.broadcast %44 : vector<32x1xf32> to vector<32x256xf32>
      %46 = arith.addf %43, %45 : vector<32x256xf32>
      %c0_27 = arith.constant 0 : index
      %c0_28 = arith.constant 0 : index
      %c0_29 = arith.constant 0 : index
      %47 = vector.load %arg2[%c0_27, %c0_28, %c0_29] : memref<1x32x256xf32, #tpu.memory_space<vmem>>, vector<1x32x256xf32>
      %48 = vector.shape_cast %47 : vector<1x32x256xf32> to vector<32x256xf32>
      %49 = arith.addf %46, %48 : vector<32x256xf32>
      %50 = vector.shape_cast %49 : vector<32x256xf32> to vector<1x32x256xf32>
      %cst_30 = arith.constant dense<0.000000e+00> : vector<1xf32>
      %51 = vector.multi_reduction <add>, %50, %cst_30 [1, 2] : vector<1x32x256xf32> to vector<1xf32>
      %52 = vector.shape_cast %51 : vector<1xf32> to vector<1x1x1xf32>
      %53 = vector.extract %52[0, 0, 0] : f32 from vector<1x1x1xf32>
      %cst_31 = arith.constant 1.22070313E-4 : f32
      %54 = arith.mulf %53, %cst_31 : f32
      %55 = arith.mulf %49, %49 : vector<32x256xf32>
      %56 = vector.shape_cast %55 : vector<32x256xf32> to vector<1x32x256xf32>
      %cst_32 = arith.constant dense<0.000000e+00> : vector<1xf32>
      %57 = vector.multi_reduction <add>, %56, %cst_32 [1, 2] : vector<1x32x256xf32> to vector<1xf32>
      %58 = vector.shape_cast %57 : vector<1xf32> to vector<1x1x1xf32>
      %59 = vector.extract %58[0, 0, 0] : f32 from vector<1x1x1xf32>
      %cst_33 = arith.constant 1.22070313E-4 : f32
      %60 = arith.mulf %59, %cst_33 : f32
      %61 = arith.mulf %54, %54 : f32
      %62 = arith.subf %60, %61 : f32
      %63 = vector.broadcast %54 : f32 to vector<32x256xf32>
      %64 = arith.subf %49, %63 : vector<32x256xf32>
      %cst_34 = arith.constant 9.99999974E-6 : f32
      %65 = arith.addf %62, %cst_34 : f32
      %66 = math.rsqrt %65 : f32
      %67 = vector.broadcast %66 : f32 to vector<32x256xf32>
      %68 = arith.mulf %64, %67 : vector<32x256xf32>
      %c0_35 = arith.constant 0 : index
      %c0_36 = arith.constant 0 : index
      %c0_37 = arith.constant 0 : index
      %69 = vector.load %arg8[%c0_35, %c0_36, %c0_37] : memref<1x32x256xf32, #tpu.memory_space<vmem>>, vector<1x32x256xf32>
      %70 = vector.shape_cast %69 : vector<1x32x256xf32> to vector<32x256xf32>
      %71 = vector.shape_cast %68 : vector<32x256xf32> to vector<1x32x256xf32>
      tpu.vector_store %arg8[%c0_35, %c0_36, %c0_37], %71 {strides = array<i32>} : memref<1x32x256xf32, #tpu.memory_space<vmem>>, vector<1x32x256xf32>,
    } else {
    }
    return
  }
  func.func @transform_0(%arg0: i32, %arg1: i32) -> (i32, i32, i32) {
    %c0_i32 = arith.constant 0 : i32
    %c0_i32_0 = arith.constant 0 : i32
    %c0_i32_1 = arith.constant 0 : i32
    return %arg0, %c0_i32, %c0_i32_0 : i32, i32, i32
  }
  func.func @transform_1(%arg0: i32, %arg1: i32) -> (i32, i32) {
    %c0_i32 = arith.constant 0 : i32
    %c0_i32_0 = arith.constant 0 : i32
    %c0_i32_1 = arith.constant 0 : i32
    return %c0_i32, %c0_i32_0 : i32, i32
  }
  func.func @transform_2(%arg0: i32, %arg1: i32) -> (i32, i32) {
    %c0_i32 = arith.constant 0 : i32
    %c0_i32_0 = arith.constant 0 : i32
    %c0_i32_1 = arith.constant 0 : i32
    return %c0_i32, %c0_i32_0 : i32, i32
  }
  func.func @transform_3(%arg0: i32, %arg1: i32) -> (i32, i32) {
    %c0_i32 = arith.constant 0 : i32
    %c0_i32_0 = arith.constant 0 : i32
    %c0_i32_1 = arith.constant 0 : i32
    return %c0_i32, %c0_i32_0 : i32, i32
  }
  func.func @transform_4(%arg0: i32, %arg1: i32) -> (i32, i32) {
    %c0_i32 = arith.constant 0 : i32
    %c0_i32_0 = arith.constant 0 : i32
    %c0_i32_1 = arith.constant 0 : i32
    return %c0_i32, %c0_i32_0 : i32, i32
  }
  func.func @transform_5(%arg0: i32, %arg1: i32) -> (i32, i32) {
    %c0_i32 = arith.constant 0 : i32
    %c0_i32_0 = arith.constant 0 : i32
    %c0_i32_1 = arith.constant 0 : i32
    return %c0_i32, %c0_i32_0 : i32, i32
  }
  func.func @transform_6(%arg0: i32, %arg1: i32) -> (i32, i32, i32) {
    %c0_i32 = arith.constant 0 : i32
    %c0_i32_0 = arith.constant 0 : i32
    %c0_i32_1 = arith.constant 0 : i32
    return %arg0, %c0_i32, %c0_i32_0 : i32, i32, i32
  }
}

</mosaic_0001>

<bundles_post_ra>
// kernel: tpu_custom_call.1
= control target key start
LH: loop header
LB: loop body
LE: loop exit
PB: predicated region body
PF: predicated region fallthrough
CT: control target
= control target key end

     0   :  { %11 = vsyncpa [#allocation7], 0  ;;  %s2551_s0 = inlined_call_operand.hbm [shape: f32[2,32,256], index: 0, kind: input, shape index: {}]   ;;  %s2552_s1 = inlined_call_operand.vmem [shape: f32[8,32], index: 1, kind: input, shape index: {}]   ;;  %s2553_s2 = inlined_call_operand.vmem [shape: bf16[32,32], index: 2, kind: input, shape index: {}]   ;;  %s2554_s3 = inlined_call_operand.vmem [shape: f32[32,1], index: 3, kind: input, shape index: {}]   ;;  %s2555_s4 = inlined_call_operand.vmem [shape: bf16[32,32], index: 4, kind: input, shape index: {}]   ;;  %s2556_s5 = inlined_call_operand.vmem [shape: f32[32,1], index: 5, kind: input, shape index: {}]   ;;  %s2557_s6 = inlined_call_operand.hbm [shape: f32[2,32,256], index: 6, kind: output, shape index: {}]  }
   0x1   :  { %13 = vsyncpa [#allocation7 + $0x1], 0 }
   0x2   :  { %14 = vsyncpa [#allocation8], 0 }
   0x3   :  { %16 = vsyncpa [#allocation8 + $0x1], 0  ;;  %s1949_s21 = smov 0   ;;  %s1951_s22 = smov 0  }
   0x4   :  { %s1953_s23 = smov 0   ;;  %s1955_s24 = smov 0  }
   0x5   :  { %s1957_s25 = smov 0   ;;  %s1959_s26 = smov 0  }
   0x6   :  { %s1961_s27 = smov 0   ;;  %s1963_s28 = smov 0  }
   0x7 LB: > { %2560 = sst [smem:[#allocation12_spill]] %s1896_s27  ;;  %s1511_s29 = sadd.s32 4294967295, %s1900_s28   ;;  %s1900_s28 = sphi %s1963_s28, %s22_s28   ;;  %s1896_s27 = sphi %s1961_s27, %s2570_s27   ;;  %s1892_s26 = sphi %s1959_s26, %s2575_s26   ;;  %s1888_s25 = sphi %s1957_s25, %s2568_s25   ;;  %s1884_s24 = sphi %s1955_s24, %s2574_s24   ;;  %s1880_s23 = sphi %s1953_s23, %s2573_s23   ;;  %s1876_s22 = sphi %s1951_s22, %s2572_s22   ;;  %s1872_s21 = sphi %s1949_s21, %s2571_s21  }
   0x8   : > { %s1512_s30 = sadd.s32 4294967294, %s1900_s28   ;;  %s31_s7 = sadd.s32 1, %s1892_s26 }
   0x9   : > { %s34_s8 = sadd.s32 1, %s1896_s27  ;;  %p32_p0 = scmp.ge.s32.totalorder %s31_s7, 2 }
   0xa   : > { %s41_s9 = sadd.s32 1, %s1880_s23  ;;  %p48_p1 = scmp.ne.s32.totalorder %s1880_s23, %s1876_s22 }
   0xb   : > { %p49_p2 = scmp.eq.s32.totalorder %s1900_s28, 0  ;;  %s2577_s7 = smov (%p32_p0, %s31_s7), 0 }
   0xc   : > { %2561 = sst [smem:[#allocation13_spill]] %s2577_s7  ;;  %s2579_s8 = smov (!%p32_p0, %s34_s8), %s1896_s27 }
   0xd   : > { %p2000_p3 = por %p49_p2, %p48_p1  ;;  %p54_p4 = scmp.ne.s32.totalorder %s1876_s22, %s1872_s21 }
   0xe   : > { %p36_p5 = scmp.ge.s32.totalorder %s2579_s8, 2  ;;  %p55_p6 = scmp.eq.s32.totalorder %s1511_s29, 0 }
   0xf   : > { %p183_p7 = scmp.eq.s32.totalorder %s1511_s29, 3  ;;  %p189_p8 = scmp.eq.s32.totalorder %s1512_s30, 3 }
  0x10   : > { %s2581_s8 = smov (%p36_p5, %s2579_s8), 0  ;;  %p2008_p9 = por %p55_p6, %p54_p4 }
  0x11   : > { %2563 = sst [smem:[#allocation14_spill]] %s2581_s8  ;;  %p2012_p10 = por %p183_p7, %p48_p1 }
  0x12   : > { %s38_s13 = ssub.s32 %s1896_s27, %s2581_s8  ;;  %p2018_p11 = por %p189_p8, %p54_p4 }
  0x13   : > { %p39_p12 = scmp.eq.s32.totalorder %s38_s13, 0  ;;  %p1590_p13 = scmp.lt.s32.totalorder %s1900_s28, 4 }
  0x14   : > { %s224_s15 = sand.u32 1, %s1880_s23   ;;  %s1562_s18 = sshll.u32 %s1896_s27, 10 }
  0x15   : > { %s2025_s16 = scalar_select %p39_p12, %s1880_s23, %s41_s9  }
  0x16   : > { %s1515_s17 = sshll.u32 %s224_s15, 6  ;;  %s234_s29 = scalar_lea.hbm %s2551_s0, %s1562_s18 }
  0x17   : > { %s228_s30 = scalar_lea.vmem [#allocation6], %s1515_s17  ;;  %p2033_p0 = pnand %p1590_p13, %p2000_p3 }
  0x18   : > { %s235_s7 = sshll.u32 %s228_s30, 4  ;;  %p1518_p1 = scmp.ge.s32.totalorder %s1900_s28, 1  ;;  %s236_s7 = int_to_ptr.vmem [resolvable:$true] %s235_s7 }
  0x19   : > { %s225_s13 = scalar_lea.sflag [#allocation7], %s224_s15  ;;  %p1778_p2 = pneg %p2033_p0 }
  0x1a   : > { %s1789_s9 = scalar_lea.vmem %s236_s7, 1024  ;;  %s1902_s27 = smov [#allocation6]  }
  0x1b   : > { %p1790_p4 = scmp.ne.s32.totalorder %s236_s7, %s1789_s9  ;;  %s1794_s19 = sshll.u32 %s1902_s27, 4  ;;  %s1795_s19 = int_to_ptr.vmem [resolvable:$false] %s1794_s19 }
  0x1c   : > { %s1796_s17 = scalar_lea.vmem %s1795_s19, 2048  ;;  %p1797_p7 = scmp.lt.s32.totalorder %s236_s7, %s1795_s19 }
  0x1d   : > { %p1792_p5 = pnand %p1790_p4, %p1778_p2  ;;  %p1798_p8 = scmp.lt.s32.totalorder %s1796_s17, %s1789_s9 }
  0x1f   : > { %p1793_p6 = pneg %p1792_p5  ;;  %p1799_p12 = por %p1798_p8, %p1797_p7 }
  0x21   : > { %p1800_p3 = pnand %p1799_p12, %p1793_p6 }
  0x23   : > { %1803 = shalt.err (!%p1800_p3)
}
  0x24   : > { %s1903_s10 = smov 256   ;;  %s1904_s15 = smov 16  }
  0x25   : > { %1585 = dma.hbm_to_vmem [thread:$0]  (!%p2033_p0), %s234_s29, 1024, %s236_s7, %s225_s13, %s1903_s10, %s1903_s10, %s1904_s15  }
  0x26   : > { %p243_p13 = scmp.lt.s32.totalorder %s1900_s28, 5 }
  0x28   : > { %p244_p2 = pnand %p1518_p1, %p243_p13 }
  0x29   : > { %s2046_s27 = sand.u32 (!%p244_p2), 1, %s1876_s22  }
  0x2a   : > { %247 = sbr.rel (%p244_p2) target bundleno = 1799 (0x707), region = 44  ;;  %s1519_s18 = sshll.u32 (!%p244_p2), %s2046_s27, 6 }
  0x2b   : > { %s250_s20 = scalar_lea.sflag (!%p244_p2), [#allocation7], %s2046_s27  ;;  %s2050_s30 = scalar_lea.vmem (!%p244_p2), [#allocation6], %s1519_s18 }
  0x2f   : > { %1863 = dma.done.wait (%p2008_p9), %s250_s20, 1024  }
  0x30   : > { %1865 = vsyncadd (%p2008_p9), %s250_s20, 4294966272  ;;  %s2056_s7 = scalar_lea.vmem [#allocation9], %s1519_s18  ;;  %p1521_p0 = scmp.ne.s32.totalorder %s1884_s24, 0 }
  0x32   : > { %286 = sbr.rel (%p1521_p0) target bundleno = 278 (0x116), region = 52 }
  0x37   : > { %v292_v0 = vld [vmem:[%s2050_s30 + $0x28] sm:$0xff]  ;;  %v294_v1 = vld [vmem:[%s2050_s30 + $0x38] sm:$0xff]  ;;  %v291_v2 = vld [vmem:[%s2050_s30 + $0x20] sm:$0xff]  ;;  %v510_v3 = vlaneseq  ;;  %v1905_v8 = vmov 0   ;;  %v1906_v9 = vmov 0.0   ;;  %vm296_vm1 = vcmask 261120  }
  0x38   : > { %v380_v4 = vpack.c.bf16 %v294_v1, %v292_v0  ;;  %v293_v5 = vld [vmem:[%s2050_s30 + $0x30] sm:$0xff]  ;;  %v288_v6 = vld [vmem:[%s2050_s30 + $0x8] sm:$0xff]  ;;  %v290_v7 = vld [vmem:[%s2050_s30 + $0x18] sm:$0xff]  ;;  %453 = vmatprep.mubr.bf16.mxu1 %v1905_v8  ;;  %324 = vmatprep.subr.mxu0 %v294_v1  ;;  %502 = vst [vmem:[#allocation4 + $0x30] sm:$0xff] %v1906_v9 }
  0x39   : > { %503 = vst [vmem:[#allocation4] sm:$0xff] %v1906_v9  ;;  %504 = vst [vmem:[#allocation4 + $0x18] sm:$0xff] %v1906_v9  ;;  %v379_v10 = vpack.c.bf16 %v293_v5, %v291_v2  ;;  %v378_v11 = vpack.c.bf16 %v290_v7, %v288_v6  ;;  %v287_v12 = vld [vmem:[%s2050_s30] sm:$0xff]  ;;  %v289_v13 = vld [vmem:[%s2050_s30 + $0x10] sm:$0xff]  ;;  %325 = vmatpush1.msra.mxu0 %v293_v5  ;;  %364 = vmatprep.mubr.f32.mxu0 %v1906_v9  ;;  %vm512_vm0 = vcmp.lt.s32.totalorder %v510_v3, 256 }
  0x3a   : > { %505 = vst [vmem:[#allocation4 + $0x10] sm:$0xff] %v1906_v9  ;;  %506 = vst [vmem:[#allocation4 + $0x8] sm:$0xff] %v1906_v9  ;;  %433 = vmatprep.subr.bf16.mxu1 %v380_v4  ;;  %326 = vmatprep.subr.mxu0 %v292_v0  ;;  %v377_v14 = vpack.c.bf16 %v289_v13, %v287_v12  ;;  %v381_v15 = vld [vmem:[%s2554_s3] sm:$0xff]  ;;  %v383_v18 = vld [vmem:[%s2554_s3 + $0x10] sm:$0xff] }
  0x3b   : > { %507 = vst [vmem:[#allocation4 + $0x20] sm:$0xff] %v1906_v9  ;;  %508 = vst [vmem:[#allocation4 + $0x28] sm:$0xff] %v1906_v9  ;;  %434 = vmatpush1.bf16.msra.mxu1 %v379_v10  ;;  %327 = vmatpush1.msra.mxu0 %v291_v2  ;;  %v295_v16 = vld [vmem:[%s2552_s1] sm:$0xff]  ;;  %v382_v19 = vld [vmem:[%s2554_s3 + $0x8] sm:$0xff] }
  0x3c   : > { %509 = vst [vmem:[#allocation4 + $0x38] sm:$0xff] %v1906_v9  ;;  %514 = vst.msk [vmem:[#allocation5] sm:$0x3] %vm512_vm0, %v1906_v9  ;;  %435 = vmatprep.subr.bf16.mxu1 %v378_v11  ;;  %328 = vmatprep.subr.mxu0 %v290_v7  ;;  %v1668_v17 = vld [vmem:[%s2553_s2] sm:$0xff]   ;;  %v384_v20 = vld [vmem:[%s2554_s3 + $0x18] sm:$0xff] }
  0x3d   : > { %329 = vmatpush1.msra.mxu0 %v289_v13  ;;  %1666 = vset.pattern.permute.xlu0 %v1905_v8  ;;  %v1669_v21 = vld [vmem:[%s2553_s2 + $0x8] sm:$0xff]  }
  0x3e   : > { %330 = vmatprep.subr.mxu0 %v288_v6  ;;  %387 = vperm.xlu0 %1666, %v381_v15  }
  0x3f   : > { %436 = vmatpush1.bf16.msra.mxu1 %v377_v14  ;;  %331 = vmatpush1.msra.mxu0 %v287_v12 }
  0x40   : > { %1522 = vmatmul.mubr.msk.f32.vlgmr.msra.gmra.mxu0 %vm296_vm1, %v295_v16  ;;  %1667 = vset.pattern.permute.xlu1 %v1905_v8 }
  0x41   : > { %397 = vperm.xlu1 %1667, %v383_v18  }
  0x42   : > { %1525 = vmatmul.mubr.msk.bf16.vlgmr.msra.gmra.mxu1 %vm296_vm1, %v1668_v17  ;;  %392 = vperm.xlu0 %1666, %v382_v19  }
  0x43   : > { %463 = vmatprep.mubr.bf16.mxu1 %v1905_v8 }
  0x45   : > { %402 = vperm.xlu1 %1667, %v384_v20  }
  0x4a   : > { %1526 = vmatmul.mubr.msk.bf16.gmra.mxu1 %vm296_vm1, %v1669_v21 }
  0xb9   : > { %v388_v22 = vpop.permute.xlu0 %387 }
  0xbc   : > { %v398_v35 = vpop.permute.xlu1 %397 }
  0xbd   : > { %v393_v29 = vpop.permute.xlu0 %392 }
  0xc0   : > { %v403_v43 = vpop.permute.xlu1 %402 }
 0x100   : > { %v366_v23 = vpop.f32.mrf.mxu0 }
 0x101   : > { %371 = vst [vmem:[#allocation2] sm:$0xff] %v366_v23 }
 0x102   : > { %v455_v24 = vpop.f32.mrf.mxu1  ;;  %v368_v25 = vpop.f32.mrf.mxu0 }
 0x103   : > { %372 = vst [vmem:[#allocation2 + $0x8] sm:$0xff] %v368_v25  ;;  %v456_v27 = vadd.f32 %v455_v24, %v388_v22 }
 0x104   : > { %v457_v26 = vpop.f32.mrf.mxu1 }
 0x105   : > { %v458_v28 = vadd.f32 %v457_v26, %v388_v22 }
 0x106   : > { %v459_v30 = vpop.f32.mrf.mxu1 }
 0x107   : > { %v1563_v31 = vpack.c.bf16 %v458_v28, %v456_v27  ;;  %v460_v33 = vadd.f32 %v459_v30, %v393_v29 }
 0x108   : > { %v461_v32 = vpop.f32.mrf.mxu1 }
 0x109   : > { %498 = vst [vmem:[#allocation3] sm:$0xff] %v1563_v31  ;;  %v462_v34 = vadd.f32 %v461_v32, %v393_v29 }
 0x10a   : > { %v465_v36 = vpop.f32.mrf.mxu1 }
 0x10b   : > { %v1564_v37 = vpack.c.bf16 %v462_v34, %v460_v33  ;;  %v466_v39 = vadd.f32 %v465_v36, %v398_v35 }
 0x10c   : > { %v467_v38 = vpop.f32.mrf.mxu1 }
 0x10d   : > { %499 = vst [vmem:[#allocation3 + $0x8] sm:$0xff] %v1564_v37  ;;  %v468_v40 = vadd.f32 %v467_v38, %v398_v35 }
 0x10e   : > { %v469_v41 = vpop.f32.mrf.mxu1 }
 0x10f   : > { %v1565_v42 = vpack.c.bf16 %v468_v40, %v466_v39  ;;  %v470_v45 = vadd.f32 %v469_v41, %v403_v43 }
 0x110   : > { %v471_v44 = vpop.f32.mrf.mxu1 }
 0x111   : > { %500 = vst [vmem:[#allocation3 + $0x10] sm:$0xff] %v1565_v42  ;;  %v472_v46 = vadd.f32 %v471_v44, %v403_v43 }
 0x113   : > { %v1566_v47 = vpack.c.bf16 %v472_v46, %v470_v45 }
 0x115   : > { %501 = vst [vmem:[#allocation3 + $0x18] sm:$0xff] %v1566_v47 }
 0x116 PF: > { %s1531_s13 = sshll.u32 %s1884_s24, 7  ;;  %v522_v48 = vld [vmem:[#allocation2 + $0x8] sm:$0xff]  ;;  %v521_v49 = vld [vmem:[#allocation2] sm:$0xff]  ;;  %v1907_v50 = vmov 0.0   ;;  %vm555_vm2 = vcmask 64512   ;;  %p1552_p9 = scmp.ne.s32.totalorder %s1884_s24, 1 }
 0x117   : > { %s516_s9 = sshra.s32 %s1531_s13, 7  ;;  %634 = vmatprep.subr.mxu0 %v522_v48  ;;  %668 = vmatprep.mubr.f32.mxu0 %v1907_v50 }
 0x118   : > { %s1532_s19 = sshll.u32 %s516_s9, 3  ;;  %s1549_s17 = sshll.u32 %s516_s9, 2  ;;  %635 = vmatpush1.msra.mxu0 %v521_v49 }
 0x119   : > { %s519_s10 = scalar_lea.vmem [#allocation2], %s1532_s19  ;;  %s2089_s15 = scalar_lea.vmem [#allocation3], %s1549_s17 }
 0x11a   : > { %v520_v51 = vld [vmem:[%s519_s10] sm:$0xff] }
 0x11b   : > { %523 = vxpose.xlu0.b32.start.end [1/1] (short) %v520_v51, 128 }
 0x197   : > { %v539_v52 = vpop.trf.xlu0 }
 0x198   : > { %1533 = vmatmul.mubr.msk.f32.vlgmr.msra.gmra.mxu0 %vm555_vm2, %v539_v52 }
 0x199   : > { %674 = vmatprep.mubr.f32.mxu0 %v1907_v50 }
 0x19b   : > { %v540_v53 = vpop.trf.xlu0 }
 0x19c   : > { %1534 = vmatmul.mubr.msk.f32.gmra.mxu0 %vm555_vm2, %v540_v53 }
 0x19d   : > { %680 = vmatprep.mubr.f32.mxu0 %v1907_v50 }
 0x19f   : > { %v541_v54 = vpop.trf.xlu0 }
 0x1a0   : > { %1535 = vmatmul.mubr.msk.f32.gmra.mxu0 %vm555_vm2, %v541_v54 }
 0x1a1   : > { %686 = vmatprep.mubr.f32.mxu0 %v1907_v50 }
 0x1a3   : > { %v542_v55 = vpop.trf.xlu0 }
 0x1a4   : > { %1536 = vmatmul.mubr.msk.f32.gmra.mxu0 %vm555_vm2, %v542_v55 }
 0x1a5   : > { %692 = vmatprep.mubr.f32.mxu0 %v1907_v50 }
 0x1a7   : > { %v543_v56 = vpop.trf.xlu0 }
 0x1a8   : > { %1537 = vmatmul.mubr.msk.f32.gmra.mxu0 %vm555_vm2, %v543_v56 }
 0x1a9   : > { %698 = vmatprep.mubr.f32.mxu0 %v1907_v50 }
 0x1ab   : > { %v544_v57 = vpop.trf.xlu0 }
 0x1ac   : > { %1538 = vmatmul.mubr.msk.f32.gmra.mxu0 %vm555_vm2, %v544_v57 }
 0x1ad   : > { %704 = vmatprep.mubr.f32.mxu0 %v1907_v50 }
 0x1af   : > { %v545_v58 = vpop.trf.xlu0 }
 0x1b0   : > { %1539 = vmatmul.mubr.msk.f32.gmra.mxu0 %vm555_vm2, %v545_v58 }
 0x1b1   : > { %710 = vmatprep.mubr.f32.mxu0 %v1907_v50 }
 0x1b3   : > { %v546_v59 = vpop.trf.xlu0 }
 0x1b4   : > { %1540 = vmatmul.mubr.msk.f32.gmra.mxu0 %vm555_vm2, %v546_v59 }
 0x1b5   : > { %716 = vmatprep.mubr.f32.mxu0 %v1907_v50 }
 0x1b7   : > { %v547_v60 = vpop.trf.xlu0 }
 0x1b8   : > { %1541 = vmatmul.mubr.msk.f32.gmra.mxu0 %vm555_vm2, %v547_v60 }
 0x1b9   : > { %722 = vmatprep.mubr.f32.mxu0 %v1907_v50 }
 0x1bb   : > { %v548_v61 = vpop.trf.xlu0 }
 0x1bc   : > { %1542 = vmatmul.mubr.msk.f32.gmra.mxu0 %vm555_vm2, %v548_v61 }
 0x1bd   : > { %728 = vmatprep.mubr.f32.mxu0 %v1907_v50 }
 0x1bf   : > { %v549_v62 = vpop.trf.xlu0 }
 0x1c0   : > { %1543 = vmatmul.mubr.msk.f32.gmra.mxu0 %vm555_vm2, %v549_v62 }
 0x1c1   : > { %734 = vmatprep.mubr.f32.mxu0 %v1907_v50 }
 0x1c3   : > { %v550_v63 = vpop.trf.xlu0 }
 0x1c4   : > { %1544 = vmatmul.mubr.msk.f32.gmra.mxu0 %vm555_vm2, %v550_v63 }
 0x1c5   : > { %740 = vmatprep.mubr.f32.mxu0 %v1907_v50 }
 0x1c7   : > { %v551_v0 = vpop.trf.xlu0 }
 0x1c8   : > { %1545 = vmatmul.mubr.msk.f32.gmra.mxu0 %vm555_vm2, %v551_v0 }
 0x1c9   : > { %746 = vmatprep.mubr.f32.mxu0 %v1907_v50 }
 0x1cb   : > { %v552_v1 = vpop.trf.xlu0 }
 0x1cc   : > { %1546 = vmatmul.mubr.msk.f32.gmra.mxu0 %vm555_vm2, %v552_v1 }
 0x1cd   : > { %752 = vmatprep.mubr.f32.mxu0 %v1907_v50 }
 0x1cf   : > { %v553_v2 = vpop.trf.xlu0 }
 0x1d0   : > { %1547 = vmatmul.mubr.msk.f32.gmra.mxu0 %vm555_vm2, %v553_v2 }
 0x1d1   : > { %758 = vmatprep.mubr.f32.mxu0 %v1907_v50 }
 0x1d3   : > { %v554_v3 = vpop.trf.xlu0 }
 0x1d4   : > { %1548 = vmatmul.mubr.msk.f32.gmra.mxu0 %vm555_vm2, %v554_v3 }
 0x258   : > { %v2107_v4 = vpop.f32.mrf.mxu0 }
 0x25a   : > { %v2109_v5 = vpop.f32.mrf.mxu0 }
 0x25b   : > { %v765_v50 = vmax.f32 %v2107_v4, %v2109_v5 }
 0x25c   : > { %v2111_v6 = vpop.f32.mrf.mxu0 }
 0x25e   : > { %v2113_v7 = vpop.f32.mrf.mxu0 }
 0x25f   : > { %v768_v51 = vmax.f32 %v2111_v6, %v2113_v7 }
 0x260   : > { %v2115_v8 = vpop.f32.mrf.mxu0 }
 0x262   : > { %v2117_v9 = vpop.f32.mrf.mxu0 }
 0x263   : > { %v771_v48 = vmax.f32 %v2115_v8, %v2117_v9 }
 0x264   : > { %v2119_v10 = vpop.f32.mrf.mxu0 }
 0x266   : > { %v2121_v11 = vpop.f32.mrf.mxu0 }
 0x267   : > { %v774_v49 = vmax.f32 %v2119_v10, %v2121_v11 }
 0x268   : > { %v2123_v12 = vpop.f32.mrf.mxu0 }
 0x26a   : > { %v2125_v13 = vpop.f32.mrf.mxu0 }
 0x26b   : > { %v777_v46 = vmax.f32 %v2123_v12, %v2125_v13 }
 0x26c   : > { %v2127_v14 = vpop.f32.mrf.mxu0 }
 0x26e   : > { %v2129_v15 = vpop.f32.mrf.mxu0 }
 0x26f   : > { %v780_v47 = vmax.f32 %v2127_v14, %v2129_v15 }
 0x270   : > { %v2131_v16 = vpop.f32.mrf.mxu0 }
 0x272   : > { %v2133_v17 = vpop.f32.mrf.mxu0 }
 0x273   : > { %v783_v43 = vmax.f32 %v2131_v16, %v2133_v17 }
 0x274   : > { %v2135_v18 = vpop.f32.mrf.mxu0 }
 0x276   : > { %v2137_v19 = vpop.f32.mrf.mxu0 }
 0x277   : > { %v786_v45 = vmax.f32 %v2135_v18, %v2137_v19 }
 0x278   : > { %v718_v20 = vpop.f32.mrf.mxu0 }
 0x27a   : > { %v720_v21 = vpop.f32.mrf.mxu0 }
 0x27b   : > { %v789_v39 = vmax.f32 %v718_v20, %v720_v21 }
 0x27c   : > { %v2139_v22 = vpop.f32.mrf.mxu0 }
 0x27e   : > { %v2141_v23 = vpop.f32.mrf.mxu0 }
 0x27f   : > { %v792_v41 = vmax.f32 %v2139_v22, %v2141_v23 }
 0x280   : > { %v730_v24 = vpop.f32.mrf.mxu0 }
 0x282   : > { %v732_v25 = vpop.f32.mrf.mxu0 }
 0x283   : > { %v795_v36 = vmax.f32 %v730_v24, %v732_v25 }
 0x284   : > { %v736_v26 = vpop.f32.mrf.mxu0 }
 0x286   : > { %v2143_v27 = vpop.f32.mrf.mxu0 }
 0x287   : > { %v798_v38 = vmax.f32 %v736_v26, %v2143_v27 }
 0x288   : > { %v2145_v28 = vpop.f32.mrf.mxu0 }
 0x28a   : > { %v2147_v29 = vpop.f32.mrf.mxu0 }
 0x28b   : > { %v801_v30 = vmax.f32 %v2145_v28, %v2147_v29 }
 0x28c   : > { %v2151_v31 = vpop.f32.mrf.mxu0 }
 0x28d   : > { %802 = vmax.xlane.f32.xlu1 %v801_v30 }
 0x28e   : > { %v2153_v32 = vpop.f32.mrf.mxu0 }
 0x28f   : > { %v804_v33 = vmax.f32 %v2151_v31, %v2153_v32 }
 0x290   : > { %v2157_v34 = vpop.f32.mrf.mxu0 }
 0x291   : > { %805 = vmax.xlane.f32.xlu1 %v804_v33 }
 0x292   : > { %v2159_v35 = vpop.f32.mrf.mxu0 }
 0x293   : > { %v807_v37 = vmax.f32 %v2157_v34, %v2159_v35 }
 0x294   : > { %v2164_v40 = vpop.f32.mrf.mxu0 }
 0x295   : > { %796 = vmax.xlane.f32.xlu1 %v795_v36  ;;  %808 = vmax.xlane.f32.xlu0 %v807_v37 }
 0x296   : > { %v2168_v42 = vpop.f32.mrf.mxu0 }
 0x297   : > { %v810_v44 = vmax.f32 %v2164_v40, %v2168_v42 }
 0x299   : > { %799 = vmax.xlane.f32.xlu1 %v798_v38 }
 0x29d   : > { %790 = vmax.xlane.f32.xlu1 %v789_v39 }
 0x2a1   : > { %793 = vmax.xlane.f32.xlu1 %v792_v41 }
 0x2a5   : > { %784 = vmax.xlane.f32.xlu1 %v783_v43 }
 0x2a9   : > { %811 = vmax.xlane.f32.xlu1 %v810_v44 }
 0x2ad   : > { %787 = vmax.xlane.f32.xlu1 %v786_v45 }
 0x2b1   : > { %778 = vmax.xlane.f32.xlu1 %v777_v46 }
 0x2b5   : > { %781 = vmax.xlane.f32.xlu1 %v780_v47 }
 0x2b9   : > { %772 = vmax.xlane.f32.xlu1 %v771_v48 }
 0x2bd   : > { %775 = vmax.xlane.f32.xlu1 %v774_v49 }
 0x2c1   : > { %766 = vmax.xlane.f32.xlu1 %v765_v50 }
 0x2c5   : > { %769 = vmax.xlane.f32.xlu1 %v768_v51 }
 0x316   : > { %v803_v52 = vpop.xlane.xlu1 %802 }
 0x317   : > { %v837_v30 = vsub.f32 %v2145_v28, %v803_v52 }
 0x31a   : > { %v806_v53 = vpop.xlane.xlu1 %805 }
 0x31b   : > { %v840_v37 = vsub.f32 %v2153_v32, %v806_v53 }
 0x31d   : > { %v899_v41 = vmul.f32 1.442695, %v840_v37 }
 0x31e   : > { %v797_v54 = vpop.xlane.xlu1 %796 }
 0x31f   : > { %v833_v56 = vsub.f32 %v730_v24, %v797_v54  ;;  %v834_v57 = vsub.f32 %v732_v25, %v797_v54  ;;  %v838_v24 = vsub.f32 %v2147_v29, %v803_v52 }
 0x321   : > { %v885_v61 = vmul.f32 1.442695, %v833_v56  ;;  %v887_v1 = vmul.f32 1.442695, %v834_v57  ;;  %v895_v36 = vmul.f32 1.442695, %v838_v24 }
 0x322   : > { %v800_v55 = vpop.xlane.xlu1 %799 }
 0x323   : > { %v835_v62 = vsub.f32 %v736_v26, %v800_v55  ;;  %v836_v2 = vsub.f32 %v2143_v27, %v800_v55  ;;  %v839_v26 = vsub.f32 %v2151_v31, %v806_v53  ;;  %v809_v27 = vpop.xlane.xlu0 %808 }
 0x324   : > { %v841_v28 = vsub.f32 %v2157_v34, %v809_v27  ;;  %v842_v29 = vsub.f32 %v2159_v35, %v809_v27 }
 0x325   : > { %v889_v33 = vmul.f32 1.442695, %v835_v62  ;;  %v891_v25 = vmul.f32 1.442695, %v836_v2  ;;  %v897_v39 = vmul.f32 1.442695, %v839_v26 }
 0x326   : > { %v791_v58 = vpop.xlane.xlu1 %790  ;;  %v901_v31 = vmul.f32 1.442695, %v841_v28  ;;  %v903_v47 = vmul.f32 1.442695, %v842_v29 }
 0x327   : > { %v829_v59 = vsub.f32 %v718_v20, %v791_v58  ;;  %v830_v60 = vsub.f32 %v720_v21, %v791_v58  ;;  %v893_v21 = vmul.f32 1.442695, %v837_v30 }
 0x329   : > { %v877_v63 = vmul.f32 1.442695, %v829_v59  ;;  %v879_v0 = vmul.f32 1.442695, %v830_v60 }
 0x32a   : > { %v794_v3 = vpop.xlane.xlu1 %793 }
 0x32b   : > { %1672 = vpow2.f32 %v877_v63  ;;  %v831_v50 = vsub.f32 %v2139_v22, %v794_v3 }
 0x32c   : > { %1674 = vpow2.f32 %v879_v0 }
 0x32d   : > { %1676 = vpow2.f32 %v885_v61  ;;  %v881_v56 = vmul.f32 1.442695, %v831_v50 }
 0x32e   : > { %1678 = vpow2.f32 %v887_v1  ;;  %v785_v20 = vpop.xlane.xlu1 %784 }
 0x32f   : > { %1680 = vpow2.f32 %v889_v33  ;;  %v825_v57 = vsub.f32 %v2131_v16, %v785_v20  ;;  %v826_v59 = vsub.f32 %v2133_v17, %v785_v20 }
 0x330   : > { %1682 = vpow2.f32 %v891_v25 }
 0x331   : > { %1684 = vpow2.f32 %v893_v21  ;;  %v869_v62 = vmul.f32 1.442695, %v825_v57  ;;  %v871_v0 = vmul.f32 1.442695, %v826_v59 }
 0x332   : > { %v812_v38 = vpop.xlane.xlu1 %811  ;;  %1686 = vpow2.f32 %v895_v36 }
 0x333   : > { %1688 = vpow2.f32 %v897_v39  ;;  %v843_v32 = vsub.f32 %v2164_v40, %v812_v38  ;;  %v844_v48 = vsub.f32 %v2168_v42, %v812_v38  ;;  %v832_v40 = vsub.f32 %v2141_v23, %v794_v3 }
 0x334   : > { %1690 = vpow2.f32 %v899_v41 }
 0x335   : > { %1692 = vpow2.f32 %v901_v31  ;;  %v905_v51 = vmul.f32 1.442695, %v843_v32  ;;  %v907_v53 = vmul.f32 1.442695, %v844_v48  ;;  %v883_v58 = vmul.f32 1.442695, %v832_v40 }
 0x336   : > { %v788_v43 = vpop.xlane.xlu1 %787  ;;  %1694 = vpow2.f32 %v903_v47 }
 0x337   : > { %1696 = vpow2.f32 %v905_v51  ;;  %v827_v63 = vsub.f32 %v2135_v18, %v788_v43  ;;  %v828_v1 = vsub.f32 %v2137_v19, %v788_v43 }
 0x338   : > { %v2195_v44 = vpop.eup %1672  ;;  %1698 = vpow2.f32 %v907_v53 }
 0x339   : > { %v2197_v45 = vpop.eup %1674  ;;  %1700 = vpow2.f32 %v881_v56  ;;  %v873_v18 = vmul.f32 1.442695, %v827_v63  ;;  %v875_v19 = vmul.f32 1.442695, %v828_v1 }
 0x33a   : > { %v2200_v46 = vpop.eup %1676  ;;  %v779_v34 = vpop.xlane.xlu1 %778  ;;  %v933_v49 = vadd.f32 %v2197_v45, %v2195_v44  ;;  %1702 = vpow2.f32 %v883_v58 }
 0x33b   : > { %v2205_v35 = vpop.eup %1678  ;;  %v821_v24 = vsub.f32 %v2123_v12, %v779_v34  ;;  %1704 = vpow2.f32 %v869_v62  ;;  %v822_v26 = vsub.f32 %v2125_v13, %v779_v34 }
 0x33c   : > { %934 = vadd.xlane.f32.xlu1 %v933_v49  ;;  %v2208_v52 = vpop.eup %1680  ;;  %v939_v42 = vadd.f32 %v2205_v35, %v2200_v46  ;;  %1706 = vpow2.f32 %v871_v0 }
 0x33d   : > { %v2215_v55 = vpop.eup %1682  ;;  %v863_v38 = vmul.f32 1.442695, %v822_v26 }
 0x33e   : > { %v2211_v54 = vpop.xlane.xlu1 %781  ;;  %v2218_v22 = vpop.eup %1684  ;;  %v942_v60 = vadd.f32 %v2215_v55, %v2208_v52 }
 0x33f   : > { %v2225_v61 = vpop.eup %1686  ;;  %v823_v12 = vsub.f32 %v2127_v14, %v2211_v54  ;;  %v824_v13 = vsub.f32 %v2129_v15, %v2211_v54 }
 0x340   : > { %940 = vadd.xlane.f32.xlu1 %v939_v42  ;;  %v2228_v16 = vpop.eup %1688  ;;  %v945_v2 = vadd.f32 %v2225_v61, %v2218_v22 }
 0x341   : > { %v2233_v3 = vpop.eup %1690  ;;  %v865_v14 = vmul.f32 1.442695, %v823_v12  ;;  %v867_v15 = vmul.f32 1.442695, %v824_v13 }
 0x342   : > { %v2221_v23 = vpop.xlane.xlu1 %772  ;;  %v2238_v21 = vpop.eup %1692  ;;  %v948_v37 = vadd.f32 %v2233_v3, %v2228_v16 }
 0x343   : > { %v817_v31 = vsub.f32 %v2115_v8, %v2221_v23  ;;  %v818_v34 = vsub.f32 %v2117_v9, %v2221_v23 }
 0x344   : > { %943 = vadd.xlane.f32.xlu1 %v942_v60 }
 0x345   : > { %v855_v51 = vmul.f32 1.442695, %v818_v34 }
 0x346   : > { %v776_v17 = vpop.xlane.xlu1 %775 }
 0x347   : > { %v819_v30 = vsub.f32 %v2119_v10, %v776_v17  ;;  %v820_v33 = vsub.f32 %v2121_v11, %v776_v17  ;;  %v2243_v10 = vpop.eup %1694  ;;  %v861_v11 = vmul.f32 1.442695, %v821_v24 }
 0x348   : > { %946 = vadd.xlane.f32.xlu1 %v945_v2  ;;  %v2247_v27 = vpop.eup %1696  ;;  %v951_v28 = vadd.f32 %v2243_v10, %v2238_v21 }
 0x349   : > { %v857_v25 = vmul.f32 1.442695, %v819_v30  ;;  %v859_v20 = vmul.f32 1.442695, %v820_v33  ;;  %v2253_v41 = vpop.eup %1698 }
 0x34a   : > { %v767_v36 = vpop.xlane.xlu1 %766  ;;  %v2259_v48 = vpop.eup %1700 }
 0x34b   : > { %1708 = vpow2.f32 %v857_v25  ;;  %v2265_v49 = vpop.eup %1702  ;;  %v813_v8 = vsub.f32 %v2107_v4, %v767_v36  ;;  %v814_v40 = vsub.f32 %v2109_v5, %v767_v36  ;;  %v1908_v36 = vmov 0  }
 0x34c   : > { %1710 = vpow2.f32 %v859_v20  ;;  %949 = vadd.xlane.f32.xlu1 %v948_v37  ;;  %v2268_v50 = vpop.eup %1704  ;;  %v936_v9 = vadd.f32 %v2265_v49, %v2259_v48  ;;  %1146 = vmatprep.mubr.bf16.mxu1 %v1908_v36 }
 0x34d   : > { %1712 = vpow2.f32 %v873_v18  ;;  %v2273_v53 = vpop.eup %1706  ;;  %v845_v56 = vmul.f32 1.442695, %v813_v8  ;;  %v847_v4 = vmul.f32 1.442695, %v814_v40 }
 0x34e   : > { %1714 = vpow2.f32 %v875_v19  ;;  %v770_v39 = vpop.xlane.xlu1 %769  ;;  %v927_v5 = vadd.f32 %v2273_v53, %v2268_v50 }
 0x34f   : > { %v815_v29 = vsub.f32 %v2111_v6, %v770_v39  ;;  %v816_v43 = vsub.f32 %v2113_v7, %v770_v39  ;;  %1716 = vpow2.f32 %v861_v11  ;;  %v954_v6 = vadd.f32 %v2253_v41, %v2247_v27 }
 0x350   : > { %952 = vadd.xlane.f32.xlu1 %v951_v28  ;;  %1718 = vpow2.f32 %v863_v38  ;;  %v853_v7 = vmul.f32 1.442695, %v817_v31 }
 0x351   : > { %v849_v32 = vmul.f32 1.442695, %v815_v29  ;;  %v851_v47 = vmul.f32 1.442695, %v816_v43 }
 0x353   : > { %1720 = vpow2.f32 %v849_v32 }
 0x354   : > { %1722 = vpow2.f32 %v851_v47  ;;  %955 = vadd.xlane.f32.xlu1 %v954_v6 }
 0x355   : > { %1724 = vpow2.f32 %v865_v14 }
 0x356   : > { %1726 = vpow2.f32 %v867_v15 }
 0x357   : > { %1728 = vpow2.f32 %v853_v7 }
 0x358   : > { %v2275_v54 = vpop.eup %1708  ;;  %937 = vadd.xlane.f32.xlu1 %v936_v9  ;;  %1730 = vpow2.f32 %v855_v51 }
 0x359   : > { %v2277_v42 = vpop.eup %1710  ;;  %1732 = vpow2.f32 %v845_v56 }
 0x35a   : > { %v2279_v57 = vpop.eup %1712  ;;  %v918_v58 = vadd.f32 %v2277_v42, %v2275_v54  ;;  %1734 = vpow2.f32 %v847_v4 }
 0x35b   : > { %v2285_v59 = vpop.eup %1714 }
 0x35c   : > { %919 = vadd.xlane.f32.xlu0 %v918_v58  ;;  %928 = vadd.xlane.f32.xlu1 %v927_v5  ;;  %v2287_v23 = vpop.eup %1716  ;;  %v930_v60 = vadd.f32 %v2285_v59, %v2279_v57 }
 0x35d   : > { %v2291_v62 = vpop.eup %1718 }
 0x35e   : > { %v921_v2 = vadd.f32 %v2291_v62, %v2287_v23 }
 0x360   : > { %v2293_v63 = vpop.eup %1720  ;;  %931 = vadd.xlane.f32.xlu1 %v930_v60 }
 0x361   : > { %v2295_v0 = vpop.eup %1722 }
 0x362   : > { %v2297_v1 = vpop.eup %1724  ;;  %v912_v17 = vadd.f32 %v2295_v0, %v2293_v63 }
 0x363   : > { %v2303_v30 = vpop.eup %1726 }
 0x364   : > { %913 = vadd.xlane.f32.xlu0 %v912_v17  ;;  %922 = vadd.xlane.f32.xlu1 %v921_v2  ;;  %v2305_v33 = vpop.eup %1728  ;;  %v924_v24 = vadd.f32 %v2303_v30, %v2297_v1 }
 0x365   : > { %v2309_v18 = vpop.eup %1730 }
 0x366   : > { %v2311_v25 = vpop.eup %1732  ;;  %v915_v20 = vadd.f32 %v2309_v18, %v2305_v33 }
 0x367   : > { %v2315_v19 = vpop.eup %1734 }
 0x368   : > { %925 = vadd.xlane.f32.xlu1 %v924_v24  ;;  %v909_v26 = vadd.f32 %v2315_v19, %v2311_v25 }
 0x36c   : > { %916 = vadd.xlane.f32.xlu1 %v915_v20 }
 0x370   : > { %910 = vadd.xlane.f32.xlu1 %v909_v26 }
 0x3c5   : > { %v935_v37 = vpop.xlane.xlu1 %934 }
 0x3c9   : > { %v941_v11 = vpop.xlane.xlu1 %940 }
 0x3cd   : > { %v944_v12 = vpop.xlane.xlu1 %943 }
 0x3d1   : > { %v947_v38 = vpop.xlane.xlu1 %946 }
 0x3d5   : > { %v950_v13 = vpop.xlane.xlu1 %949 }
 0x3d6   : > { %1736 = vrcp.f32 %v950_v13 }
 0x3d9   : > { %v953_v39 = vpop.xlane.xlu1 %952 }
 0x3da   : > { %1738 = vrcp.f32 %v953_v39 }
 0x3db   : > { %1740 = vrcp.f32 %v947_v38 }
 0x3dd   : > { %v956_v28 = vpop.xlane.xlu1 %955 }
 0x3de   : > { %1742 = vrcp.f32 %v956_v28 }
 0x3df   : > { %1744 = vrcp.f32 %v944_v12 }
 0x3e0   : > { %1746 = vrcp.f32 %v941_v11 }
 0x3e1   : > { %v938_v29 = vpop.xlane.xlu1 %937 }
 0x3e2   : > { %1748 = vrcp.f32 %v938_v29 }
 0x3e3   : > { %1750 = vrcp.f32 %v935_v37  ;;  %v1737_v14 = vpop.eup %1736 }
 0x3e4   : > { %v2321_v34 = vmul.f32 %v1737_v14, %v2233_v3 }
 0x3e5   : > { %v929_v43 = vpop.xlane.xlu1 %928  ;;  %v920_v5 = vpop.xlane.xlu0 %919 }
 0x3e6   : > { %1752 = vrcp.f32 %v929_v43 }
 0x3e7   : > { %v1739_v31 = vpop.eup %1738 }
 0x3e8   : > { %v1741_v47 = vpop.eup %1740  ;;  %v2324_v6 = vmul.f32 %v1739_v31, %v2243_v10  ;;  %v2330_v8 = vmul.f32 %v1739_v31, %v2238_v21 }
 0x3e9   : > { %v932_v32 = vpop.xlane.xlu1 %931  ;;  %v2340_v10 = vmul.f32 %v1741_v47, %v2225_v61  ;;  %v2351_v17 = vmul.f32 %v1741_v47, %v2218_v22 }
 0x3ea   : > { %1754 = vrcp.f32 %v932_v32 }
 0x3eb   : > { %v1743_v15 = vpop.eup %1742  ;;  %v1099_v21 = vpack.c.bf16 %v2321_v34, %v2340_v10 }
 0x3ec   : > { %v2327_v7 = vmul.f32 %v1743_v15, %v2253_v41  ;;  %v2333_v51 = vmul.f32 %v1743_v15, %v2247_v27  ;;  %v1745_v40 = vpop.eup %1744  ;;  %v2343_v41 = vmul.f32 %v1737_v14, %v2228_v16 }
 0x3ed   : > { %v923_v9 = vpop.xlane.xlu1 %922  ;;  %v1747_v4 = vpop.eup %1746  ;;  %v2348_v27 = vmul.f32 %v1745_v40, %v2215_v55  ;;  %v2359_v24 = vmul.f32 %v1745_v40, %v2208_v52 }
 0x3ee   : > { %v1101_v56 = vpack.c.bf16 %v2327_v7, %v2324_v6  ;;  %v1100_v3 = vpack.c.bf16 %v2333_v51, %v2330_v8  ;;  %1756 = vrcp.f32 %v923_v9  ;;  %v2354_v61 = vmul.f32 %v1747_v4, %v2205_v35  ;;  %v914_v22 = vpop.xlane.xlu0 %913 }
 0x3ef   : > { %v1749_v58 = vpop.eup %1748  ;;  %v1098_v2 = vpack.c.bf16 %v2343_v41, %v2351_v17  ;;  %v2367_v35 = vmul.f32 %v1747_v4, %v2200_v46 }
 0x3f0   : > { %1114 = vmatprep.subr.bf16.mxu1 %v1101_v56  ;;  %v1751_v16 = vpop.eup %1750  ;;  %v1097_v55 = vpack.c.bf16 %v2348_v27, %v2354_v61  ;;  %v2364_v20 = vmul.f32 %v1749_v58, %v2265_v49  ;;  %v2375_v38 = vmul.f32 %v1749_v58, %v2259_v48 }
 0x3f1   : > { %1115 = vmatpush1.bf16.msra.mxu1 %v1100_v3  ;;  %v926_v60 = vpop.xlane.xlu1 %925  ;;  %v2370_v11 = vmul.f32 %v1751_v16, %v2197_v45  ;;  %v1096_v12 = vpack.c.bf16 %v2359_v24, %v2367_v35  ;;  %v989_v39 = vmul.f32 %v1751_v16, %v2195_v44 }
 0x3f2   : > { %1758 = vrcp.f32 %v926_v60  ;;  %1116 = vmatprep.subr.bf16.mxu1 %v1099_v21 }
 0x3f3   : > { %1760 = vrcp.f32 %v920_v5  ;;  %v1753_v37 = vpop.eup %1752  ;;  %v1095_v49 = vpack.c.bf16 %v2364_v20, %v2370_v11  ;;  %v1094_v28 = vpack.c.bf16 %v2375_v38, %v989_v39 }
 0x3f4   : > { %v986_v45 = vmul.f32 %v1753_v37, %v2273_v53  ;;  %v985_v14 = vmul.f32 %v1753_v37, %v2268_v50 }
 0x3f5   : > { %1117 = vmatpush1.bf16.msra.mxu1 %v1098_v2  ;;  %v917_v26 = vpop.xlane.xlu1 %916 }
 0x3f6   : > { %1762 = vrcp.f32 %v917_v26  ;;  %1118 = vmatprep.subr.bf16.mxu1 %v1097_v55  ;;  %v1670_v55 = vld [vmem:[%s2089_s15] ss:$8 sps:$4 sm:$0xff]  }
 0x3f7   : > { %v1755_v52 = vpop.eup %1754  ;;  %1764 = vrcp.f32 %v914_v22 }
 0x3f8   : > { %v988_v46 = vmul.f32 %v1755_v52, %v2285_v59  ;;  %v987_v29 = vmul.f32 %v1755_v52, %v2279_v57 }
 0x3f9   : > { %1119 = vmatpush1.bf16.msra.mxu1 %v1096_v12  ;;  %v911_v13 = vpop.xlane.xlu1 %910  ;;  %v1671_v12 = vld [vmem:[%s2089_s15 + $0x10] ss:$8 sps:$4 sm:$0xff]  }
 0x3fa   : > { %1766 = vrcp.f32 %v911_v13  ;;  %1120 = vmatprep.subr.bf16.mxu1 %v1095_v49  ;;  %v1093_v48 = vpack.c.bf16 %v988_v46, %v986_v45  ;;  %v1092_v59 = vpack.c.bf16 %v987_v29, %v985_v14 }
 0x3fb   : > { %v1757_v43 = vpop.eup %1756 }
 0x3fc   : > { %v982_v32 = vmul.f32 %v1757_v43, %v2291_v62  ;;  %v981_v47 = vmul.f32 %v1757_v43, %v2287_v23 }
 0x3fd   : > { %1121 = vmatpush1.bf16.msra.mxu1 %v1094_v28 }
 0x3fe   : > { %1122 = vmatprep.subr.bf16.mxu1 %v1093_v48 }
 0x3ff   : > { %v1759_v31 = vpop.eup %1758 }
 0x400   : > { %v984_v44 = vmul.f32 %v1759_v31, %v2303_v30  ;;  %v983_v53 = vmul.f32 %v1759_v31, %v2297_v1  ;;  %v1761_v15 = vpop.eup %1760 }
 0x401   : > { %1123 = vmatpush1.bf16.msra.mxu1 %v1092_v59  ;;  %v980_v50 = vmul.f32 %v1761_v15, %v2277_v42  ;;  %v979_v62 = vmul.f32 %v1761_v15, %v2275_v54 }
 0x402   : > { %v1091_v40 = vpack.c.bf16 %v984_v44, %v982_v32  ;;  %v1090_v57 = vpack.c.bf16 %v983_v53, %v981_v47 }
 0x403   : > { %v1763_v9 = vpop.eup %1762 }
 0x404   : > { %1124 = vmatprep.subr.bf16.mxu1 %v1091_v40  ;;  %v978_v56 = vmul.f32 %v1763_v9, %v2309_v18  ;;  %v977_v3 = vmul.f32 %v1763_v9, %v2305_v33  ;;  %v1765_v4 = vpop.eup %1764 }
 0x405   : > { %1125 = vmatpush1.bf16.msra.mxu1 %v1090_v57  ;;  %v976_v58 = vmul.f32 %v1765_v4, %v2295_v0  ;;  %v975_v18 = vmul.f32 %v1765_v4, %v2293_v63 }
 0x406   : > { %v1089_v30 = vpack.c.bf16 %v980_v50, %v978_v56  ;;  %v1088_v23 = vpack.c.bf16 %v979_v62, %v977_v3 }
 0x407   : > { %v1767_v1 = vpop.eup %1766 }
 0x408   : > { %1126 = vmatprep.subr.bf16.mxu1 %v1089_v30  ;;  %v974_v21 = vmul.f32 %v1767_v1, %v2315_v19  ;;  %v973_v5 = vmul.f32 %v1767_v1, %v2311_v25  ;;  %v1078_v30 = vld [vmem:[#allocation4 + $0x30] sm:$0xff]  ;;  %v1079_v1 = vld [vmem:[#allocation4] sm:$0xff] }
 0x409   : > { %1127 = vmatpush1.bf16.msra.mxu1 %v1088_v23 }
 0x40a   : > { %v1027_v42 = vadd.f32 %v976_v58, %v974_v21  ;;  %v1087_v33 = vpack.c.bf16 %v976_v58, %v974_v21  ;;  %v1006_v60 = vadd.f32 %v975_v18, %v973_v5  ;;  %v1086_v54 = vpack.c.bf16 %v975_v18, %v973_v5  ;;  %v1080_v5 = vld [vmem:[#allocation4 + $0x18] sm:$0xff] }
 0x40c   : > { %v1028_v16 = vadd.f32 %v1027_v42, %v978_v56  ;;  %1128 = vmatprep.subr.bf16.mxu1 %v1087_v33  ;;  %v1007_v2 = vadd.f32 %v1006_v60, %v977_v3  ;;  %v1005_v3 = vld [vmem:[#allocation5] sm:$0x3]  ;;  %v1081_v33 = vld [vmem:[#allocation4 + $0x10] sm:$0xff] }
 0x40d   : > { %1129 = vmatpush1.bf16.msra.mxu1 %v1086_v54 }
 0x40e   : > { %v1029_v22 = vadd.f32 %v1028_v16, %v980_v50  ;;  %v1008_v26 = vadd.f32 %v1007_v2, %v979_v62  ;;  %v1082_v16 = vld [vmem:[#allocation4 + $0x8] sm:$0xff] }
 0x410   : > { %v1030_v19 = vadd.f32 %v1029_v22, %v982_v32  ;;  %v1009_v37 = vadd.f32 %v1008_v26, %v981_v47  ;;  %1147 = vmatmul.mubr.bf16.vlgmr.msra.gmra.mxu1 %v1670_v55  ;;  %v1909_v47 = vmov 1966171168   ;;  %v1083_v22 = vld [vmem:[#allocation4 + $0x20] sm:$0xff] }
 0x411   : > { %1156 = vmatprep.mubr.bf16.mxu1 %v1908_v36 }
 0x412   : > { %v1031_v0 = vadd.f32 %v1030_v19, %v984_v44  ;;  %v1010_v63 = vadd.f32 %v1009_v37, %v983_v53  ;;  %v1054_v53 = vlaneseq  ;;  %v1084_v37 = vld [vmem:[#allocation4 + $0x28] sm:$0xff] }
 0x414   : > { %v1032_v25 = vadd.f32 %v1031_v0, %v986_v45  ;;  %v1011_v52 = vadd.f32 %v1010_v63, %v985_v14  ;;  %v2415_v57 = vshrl.u32 %v1054_v53, 7  ;;  %vm1069_vm3 = vcmp.lt.s32.totalorder %v1054_v53, 256 }
 0x416   : > { %v1033_v49 = vadd.f32 %v1032_v25, %v988_v46  ;;  %v1012_v13 = vadd.f32 %v1011_v52, %v987_v29  ;;  %v1085_v25 = vld [vmem:[#allocation4 + $0x38] sm:$0xff] }
 0x418   : > { %v1034_v28 = vadd.f32 %v1033_v49, %v2370_v11  ;;  %v1013_v48 = vadd.f32 %v1012_v13, %v989_v39  ;;  %1157 = vmatmul.mubr.bf16.gmra.mxu1 %v1671_v12 }
 0x41a   : > { %v1035_v43 = vadd.f32 %v1034_v28, %v2364_v20  ;;  %v1014_v31 = vadd.f32 %v1013_v48, %v2375_v38 }
 0x41c   : > { %v1036_v59 = vadd.f32 %v1035_v43, %v2354_v61  ;;  %v1015_v32 = vadd.f32 %v1014_v31, %v2367_v35 }
 0x41e   : > { %v1037_v36 = vadd.f32 %v1036_v59, %v2348_v27  ;;  %v1016_v45 = vadd.f32 %v1015_v32, %v2359_v24 }
 0x420   : > { %v1038_v14 = vadd.f32 %v1037_v36, %v2340_v10  ;;  %v1017_v46 = vadd.f32 %v1016_v45, %v2351_v17  ;;  %v1052_v10 = vunpack.c.l.s4 %v1909_v47 }
 0x422   : > { %v1039_v11 = vadd.f32 %v1038_v14, %v2321_v34  ;;  %v1018_v39 = vadd.f32 %v1017_v46, %v2343_v41  ;;  %v1053_v41 = vunpack.c.0.s8 %v1052_v10 }
 0x424   : > { %v1040_v20 = vadd.f32 %v1039_v11, %v2324_v6  ;;  %v1019_v38 = vadd.f32 %v1018_v39, %v2330_v8 }
 0x426   : > { %v1041_v61 = vadd.f32 %v1040_v20, %v2327_v7  ;;  %v1020_v35 = vadd.f32 %v1019_v38, %v2333_v51  ;;  %v1056_v51 = vsub.s32 %v1053_v41, %v2415_v57 }
 0x428   : > { %v1042_v29 = vrot.slane %v1041_v61, 4  ;;  %v1021_v27 = vrot.slane %v1020_v35, 4 }
 0x42a   : > { %v1043_v44 = vadd.f32 %v1042_v29, %v1041_v61  ;;  %v1022_v24 = vadd.f32 %v1021_v27, %v1020_v35 }
 0x42c   : > { %v1044_v17 = vrot.slane %v1043_v44, 2  ;;  %v1023_v15 = vrot.slane %v1022_v24, 2 }
 0x42e   : > { %v1045_v34 = vadd.f32 %v1044_v17, %v1043_v44  ;;  %v1024_v40 = vadd.f32 %v1023_v15, %v1022_v24 }
 0x430   : > { %v1046_v6 = vrot.slane %v1045_v34, 1  ;;  %v1025_v8 = vrot.slane %v1024_v40, 1 }
 0x432   : > { %v1047_v9 = vadd.f32 %v1046_v6, %v1045_v34  ;;  %v1026_v7 = vadd.f32 %v1025_v8, %v1024_v40 }
 0x434   : > { %v1050_v56 = vcombine.low %v1026_v7, %v1047_v9 }
 0x436   : > { %v1057_v50 = vrot.slane %v1050_v56, %v1056_v51 }
 0x438   : > { %v1064_v62 = vrot.slane %v1057_v50, %v1056_v51 }
 0x43a   : > { %v1066_v4 = vadd.f32 %v1064_v62, %v1005_v3 }
 0x43c   : > { %1071 = vst.msk [vmem:[#allocation5] sm:$0x3] %vm1069_vm3, %v1066_v4 }
 0x4d0   : > { %v1148_v23 = vpop.f32.mrf.mxu1 }
 0x4d1   : > { %v1167_v21 = vadd.f32 %v1148_v23, %v1078_v30 }
 0x4d2   : > { %v1150_v58 = vpop.f32.mrf.mxu1 }
 0x4d3   : > { %1175 = vst [vmem:[#allocation4 + $0x30] sm:$0xff] %v1167_v21  ;;  %v1168_v18 = vadd.f32 %v1150_v58, %v1079_v1 }
 0x4d4   : > { %v1152_v42 = vpop.f32.mrf.mxu1 }
 0x4d5   : > { %1176 = vst [vmem:[#allocation4] sm:$0xff] %v1168_v18  ;;  %v1169_v60 = vadd.f32 %v1152_v42, %v1080_v5 }
 0x4d6   : > { %v1154_v54 = vpop.f32.mrf.mxu1 }
 0x4d7   : > { %1177 = vst [vmem:[#allocation4 + $0x18] sm:$0xff] %v1169_v60  ;;  %v1170_v2 = vadd.f32 %v1154_v54, %v1081_v33 }
 0x4d8   : > { %v1158_v55 = vpop.f32.mrf.mxu1 }
 0x4d9   : > { %1178 = vst [vmem:[#allocation4 + $0x10] sm:$0xff] %v1170_v2  ;;  %v1171_v26 = vadd.f32 %v1158_v55, %v1082_v16 }
 0x4da   : > { %v1160_v19 = vpop.f32.mrf.mxu1 }
 0x4db   : > { %1179 = vst [vmem:[#allocation4 + $0x8] sm:$0xff] %v1171_v26  ;;  %v1172_v0 = vadd.f32 %v1160_v19, %v1083_v22 }
 0x4dc   : > { %v1162_v63 = vpop.f32.mrf.mxu1 }
 0x4dd   : > { %1180 = vst [vmem:[#allocation4 + $0x20] sm:$0xff] %v1172_v0  ;;  %v1173_v52 = vadd.f32 %v1162_v63, %v1084_v37  ;;  %1186 = sbr.rel (%p1552_p9) target bundleno = 1775 (0x6ef), region = 56 }
 0x4de   : > { %v1164_v12 = vpop.f32.mrf.mxu1 }
 0x4df   : > { %1181 = vst [vmem:[#allocation4 + $0x28] sm:$0xff] %v1173_v52  ;;  %v1174_v49 = vadd.f32 %v1164_v12, %v1085_v25 }
 0x4e1   : > { %1182 = vst [vmem:[#allocation4 + $0x38] sm:$0xff] %v1174_v49 }
 0x4e2   : > { %v1187_v13 = vld [vmem:[#allocation5] sm:$0x3]  ;;  %v1910_v48 = vmov 0   ;;  %v1225_v43 = vld [vmem:[%s2556_s5] sm:$0xff]  ;;  %v1226_v59 = vld [vmem:[%s2556_s5 + $0x8] sm:$0xff]  ;;  %v1205_v36 = vsub.s32 1, %v2415_v57 }
 0x4e3   : > { %v1188_v28 = vadd.f32 1e-09, %v1187_v13  ;;  %1298 = vmatprep.mubr.bf16.mxu0 %v1910_v48  ;;  %1308 = vmatprep.mubr.bf16.mxu1 %v1910_v48  ;;  %v1227_v31 = vld [vmem:[%s2556_s5 + $0x10] sm:$0xff]  ;;  %v1228_v32 = vld [vmem:[%s2556_s5 + $0x18] sm:$0xff]  ;;  %v1201_v45 = vsub.s32 0, %v2415_v57  ;;  %v1193_v29 = vld [vmem:[#allocation4 + $0x10] sm:$0xff] }
 0x4e4   : > { %1768 = vset.pattern.permute.xlu0 %v1910_v48  ;;  %1769 = vset.pattern.permute.xlu1 %v1910_v48  ;;  %v1195_v14 = vld [vmem:[#allocation4 + $0x20] sm:$0xff]  ;;  %v1194_v39 = vld [vmem:[#allocation4 + $0x8] sm:$0xff]  ;;  %v1190_v27 = vld [vmem:[#allocation4 + $0x30] sm:$0xff]  ;;  %vm1259_vm4 = vcmask 261120  }
 0x4e5   : > { %1772 = vrcp.f32 %v1188_v28  ;;  %1231 = vperm.xlu0 %1768, %v1225_v43   ;;  %1241 = vperm.xlu1 %1769, %v1227_v31   ;;  %v1191_v38 = vld [vmem:[#allocation4] sm:$0xff]  ;;  %v1192_v44 = vld [vmem:[#allocation4 + $0x18] sm:$0xff]  ;;  %v1770_v9 = vld [vmem:[%s2555_s4] sm:$0xff]  }
 0x4e6   : > { %v1196_v20 = vld [vmem:[#allocation4 + $0x28] sm:$0xff]  ;;  %v1771_v7 = vld [vmem:[%s2555_s4 + $0x8] sm:$0xff]  }
 0x4e7   : > { %v1319_v3 = vld [vmem:[%s2050_s30] sm:$0xff]  ;;  %v1320_v23 = vld [vmem:[%s2050_s30 + $0x8] sm:$0xff]  ;;  %v1321_v60 = vld [vmem:[%s2050_s30 + $0x10] sm:$0xff] }
 0x4e8   : > { %v1197_v46 = vld [vmem:[#allocation4 + $0x38] sm:$0xff]  ;;  %v1323_v42 = vld [vmem:[%s2050_s30 + $0x20] sm:$0xff]  ;;  %v1324_v12 = vld [vmem:[%s2050_s30 + $0x28] sm:$0xff] }
 0x4e9   : > { %1236 = vperm.xlu0 %1768, %v1226_v59   ;;  %1246 = vperm.xlu1 %1769, %v1228_v32   ;;  %v1322_v0 = vld [vmem:[%s2050_s30 + $0x18] sm:$0xff] }
 0x4f2   : > { %v1773_v11 = vpop.eup %1772 }
 0x4f3   : > { %v1206_v61 = vrot.slane %v1773_v11, %v1205_v36  ;;  %v1202_v35 = vrot.slane %v1773_v11, %v1201_v45  ;;  %v1325_v45 = vld [vmem:[%s2050_s30 + $0x30] sm:$0xff] }
 0x4f5   : > { %v1214_v24 = vmul.f32 %v1206_v61, %v1195_v14  ;;  %v1216_v47 = vmul.f32 %v1206_v61, %v1197_v46  ;;  %v1213_v10 = vmul.f32 %v1202_v35, %v1194_v39  ;;  %v1215_v53 = vmul.f32 %v1202_v35, %v1196_v20  ;;  %v1326_v20 = vld [vmem:[%s2050_s30 + $0x38] sm:$0xff] }
 0x4f6   : > { %v1210_v17 = vmul.f32 %v1206_v61, %v1191_v38  ;;  %v1212_v15 = vmul.f32 %v1206_v61, %v1193_v29  ;;  %v1209_v34 = vmul.f32 %v1202_v35, %v1190_v27  ;;  %v1211_v40 = vmul.f32 %v1202_v35, %v1192_v44 }
 0x4f7   : > { %v1224_v41 = vpack.c.bf16 %v1216_v47, %v1214_v24  ;;  %v1223_v57 = vpack.c.bf16 %v1215_v53, %v1213_v10 }
 0x4f8   : > { %v1222_v6 = vpack.c.bf16 %v1212_v15, %v1210_v17  ;;  %v1221_v8 = vpack.c.bf16 %v1211_v40, %v1209_v34 }
 0x4f9   : > { %1278 = vmatprep.subr.bf16.mxu0 %v1224_v41  ;;  %1568 = vmatprep.subr.bf16.mxu1 %v1224_v41 }
 0x4fa   : > { %1279 = vmatpush1.bf16.msra.mxu0 %v1223_v57  ;;  %1570 = vmatpush1.bf16.msra.mxu1 %v1223_v57 }
 0x4fb   : > { %1280 = vmatprep.subr.bf16.mxu0 %v1222_v6  ;;  %1569 = vmatprep.subr.bf16.mxu1 %v1222_v6 }
 0x4fe   : > { %1281 = vmatpush1.bf16.msra.mxu0 %v1221_v8  ;;  %1571 = vmatpush1.bf16.msra.mxu1 %v1221_v8 }
 0x501   : > { %1555 = vmatmul.mubr.msk.bf16.vlgmr.msra.gmra.mxu0 %vm1259_vm4, %v1770_v9  ;;  %1556 = vmatmul.mubr.msk.bf16.vlgmr.msra.gmra.mxu1 %vm1259_vm4, %v1771_v7 }
 0x560   : > { %v1232_v51 = vpop.permute.xlu0 %1231  ;;  %v1242_v56 = vpop.permute.xlu1 %1241 }
 0x564   : > { %v1237_v58 = vpop.permute.xlu0 %1236  ;;  %v1247_v55 = vpop.permute.xlu1 %1246 }
 0x5c1   : > { %v1300_v50 = vpop.f32.mrf.mxu0  ;;  %v1310_v62 = vpop.f32.mrf.mxu1 }
 0x5c2   : > { %v1301_v4 = vadd.f32 %v1300_v50, %v1232_v51  ;;  %v1311_v1 = vadd.f32 %v1310_v62, %v1242_v56 }
 0x5c3   : > { %v1302_v30 = vpop.f32.mrf.mxu0  ;;  %v1312_v21 = vpop.f32.mrf.mxu1 }
 0x5c4   : > { %v2441_v5 = vadd.f32 %v1319_v3, %v1301_v4  ;;  %v1303_v18 = vadd.f32 %v1302_v30, %v1232_v51  ;;  %v2449_v26 = vadd.f32 %v1323_v42, %v1311_v1  ;;  %v1313_v19 = vadd.f32 %v1312_v21, %v1242_v56 }
 0x5c5   : > { %v1304_v33 = vpop.f32.mrf.mxu0  ;;  %v1314_v54 = vpop.f32.mrf.mxu1 }
 0x5c6   : > { %v2445_v16 = vadd.f32 %v1320_v23, %v1303_v18  ;;  %v1305_v2 = vadd.f32 %v1304_v33, %v1237_v58  ;;  %v1352_v22 = vmul.f32 %v2441_v5, %v2441_v5  ;;  %v1315_v13 = vadd.f32 %v1314_v54, %v1247_v55 }
 0x5c7   : > { %v1306_v37 = vpop.f32.mrf.mxu0  ;;  %v1316_v28 = vpop.f32.mrf.mxu1  ;;  %v1356_v32 = vmul.f32 %v2449_v26, %v2449_v26  ;;  %v2466_v36 = vadd.f32 %v1324_v12, %v1313_v19 }
 0x5c8   : > { %v1335_v63 = vadd.f32 %v2445_v16, %v2441_v5  ;;  %v1353_v25 = vmul.f32 %v2445_v16, %v2445_v16  ;;  %v2456_v52 = vadd.f32 %v1321_v60, %v1305_v2  ;;  %v1307_v49 = vadd.f32 %v1306_v37, %v1237_v58 }
 0x5c9   : > { %v1317_v39 = vadd.f32 %v1316_v28, %v1247_v55  ;;  %v1333_v61 = vadd.f32 %v1325_v45, %v1315_v13  ;;  %v1357_v29 = vmul.f32 %v2466_v36, %v2466_v36 }
 0x5ca   : > { %v1360_v48 = vadd.f32 %v1353_v25, %v1352_v22  ;;  %v1336_v43 = vadd.f32 %v1335_v63, %v2456_v52  ;;  %v1354_v31 = vmul.f32 %v2456_v52, %v2456_v52  ;;  %v2462_v59 = vadd.f32 %v1322_v0, %v1307_v49 }
 0x5cb   : > { %v1334_v27 = vadd.f32 %v1326_v20, %v1317_v39  ;;  %v1358_v10 = vmul.f32 %v1333_v61, %v1333_v61 }
 0x5cc   : > { %v1361_v14 = vadd.f32 %v1360_v48, %v1354_v31  ;;  %v1337_v46 = vadd.f32 %v1336_v43, %v2462_v59  ;;  %v1355_v11 = vmul.f32 %v2462_v59, %v2462_v59 }
 0x5cd   : > { %v1359_v15 = vmul.f32 %v1334_v27, %v1334_v27 }
 0x5ce   : > { %v1362_v38 = vadd.f32 %v1361_v14, %v1355_v11  ;;  %v1338_v35 = vadd.f32 %v1337_v46, %v2449_v26 }
 0x5d0   : > { %v1339_v44 = vadd.f32 %v1338_v35, %v2466_v36  ;;  %v1363_v24 = vadd.f32 %v1362_v38, %v1356_v32 }
 0x5d2   : > { %v1340_v47 = vadd.f32 %v1339_v44, %v1333_v61  ;;  %v1364_v53 = vadd.f32 %v1363_v24, %v1357_v29 }
 0x5d4   : > { %v1341_v17 = vadd.f32 %v1340_v47, %v1334_v27  ;;  %v1365_v34 = vadd.f32 %v1364_v53, %v1358_v10 }
 0x5d6   : > { %1342 = vadd.xlane.f32.xlu0 %v1341_v17  ;;  %v1366_v40 = vadd.f32 %v1365_v34, %v1359_v15 }
 0x5d8   : > { %1367 = vadd.xlane.f32.xlu1 %v1366_v40 }
 0x65f   : > { %v1343_v41 = vpop.xlane.xlu0 %1342 }
 0x660   : > { %v1344_v57 = vrot.slane %v1343_v41, 4 }
 0x661   : > { %v1368_v6 = vpop.xlane.xlu1 %1367 }
 0x662   : > { %v1345_v8 = vadd.f32 %v1344_v57, %v1343_v41  ;;  %v1369_v9 = vrot.slane %v1368_v6, 4 }
 0x664   : > { %v1346_v7 = vrot.slane %v1345_v8, 2  ;;  %v1370_v51 = vadd.f32 %v1369_v9, %v1368_v6 }
 0x666   : > { %v1371_v56 = vrot.slane %v1370_v51, 2  ;;  %v1347_v50 = vadd.f32 %v1346_v7, %v1345_v8 }
 0x668   : > { %v1372_v3 = vadd.f32 %v1371_v56, %v1370_v51  ;;  %v1348_v62 = vrot.slane %v1347_v50, 1 }
 0x66a   : > { %v1349_v4 = vadd.f32 %v1348_v62, %v1347_v50  ;;  %v1373_v30 = vrot.slane %v1372_v3, 1 }
 0x66c   : > { %1572 = vpush %v1349_v4  ;;  %v1374_v23 = vadd.f32 %v1373_v30, %v1372_v3 }
 0x66e   : > { %1574 = vpush %v1374_v23 }
 0x69d   : > { %s1573_s30 = spop %1572 }
 0x69e   : > { %s1351_s18 = smul.f32 0.00012207031, %s1573_s30 }
 0x69f   : > { %s1575_s20 = spop %1574 }
 0x6a0   : > { %s1377_s8 = smul.f32 %s1351_s18, %s1351_s18  ;;  %v1379_v58 = vstv %s1351_s18 }
 0x6a1   : > { %s1376_s11 = smul.f32 0.00012207031, %s1575_s20  ;;  %v1380_v18 = vsub.f32 %v2441_v5, %v1379_v58  ;;  %v1381_v42 = vsub.f32 %v2445_v16, %v1379_v58  ;;  %v1382_v33 = vsub.f32 %v2456_v52, %v1379_v58  ;;  %v1383_v60 = vsub.f32 %v2462_v59, %v1379_v58 }
 0x6a2   : > { %v1384_v54 = vsub.f32 %v2449_v26, %v1379_v58  ;;  %v1385_v2 = vsub.f32 %v2466_v36, %v1379_v58  ;;  %v1386_v55 = vsub.f32 %v1333_v61, %v1379_v58  ;;  %v1387_v22 = vsub.f32 %v1334_v27, %v1379_v58 }
 0x6a3   : > { %s1378_s24 = ssub.f32 %s1376_s11, %s1377_s8 }
 0x6a5   : > { %s1388_s29 = sadd.f32 1e-05, %s1378_s24 }
 0x6a7   : > { %v1389_v1 = vstv %s1388_s29 }
 0x6a8   : > { %1774 = vrsqrt.f32 %v1389_v1 }
 0x6b5   : > { %v1775_v21 = vpop.eup %1774 }
 0x6b6   : > { %1576 = vpush %v1775_v21 }
 0x6e7   : > { %s1577_s13 = spop %1576 }
 0x6e8   : > { %v1392_v5 = vstv %s1577_s13 }
 0x6e9   : > { %v1393_v16 = vmul.f32 %v1392_v5, %v1380_v18  ;;  %v1394_v19 = vmul.f32 %v1392_v5, %v1381_v42  ;;  %v1395_v37 = vmul.f32 %v1392_v5, %v1382_v33  ;;  %v1396_v0 = vmul.f32 %v1392_v5, %v1383_v60 }
 0x6ea   : > { %v1397_v63 = vmul.f32 %v1392_v5, %v1384_v54  ;;  %v1398_v25 = vmul.f32 %v1392_v5, %v1385_v2  ;;  %v1399_v52 = vmul.f32 %v1392_v5, %v1386_v55  ;;  %v1400_v26 = vmul.f32 %v1392_v5, %v1387_v22 }
 0x6eb   : > { %1401 = vst [vmem:[%s2056_s7] sm:$0xff] %v1393_v16  ;;  %1402 = vst [vmem:[%s2056_s7 + $0x8] sm:$0xff] %v1394_v19 }
 0x6ec   : > { %1403 = vst [vmem:[%s2056_s7 + $0x10] sm:$0xff] %v1395_v37  ;;  %1404 = vst [vmem:[%s2056_s7 + $0x18] sm:$0xff] %v1396_v0 }
 0x6ed   : > { %1405 = vst [vmem:[%s2056_s7 + $0x20] sm:$0xff] %v1397_v63  ;;  %1406 = vst [vmem:[%s2056_s7 + $0x28] sm:$0xff] %v1398_v25 }
 0x6ee   : > { %1407 = vst [vmem:[%s2056_s7 + $0x30] sm:$0xff] %v1399_v52  ;;  %1408 = vst [vmem:[%s2056_s7 + $0x38] sm:$0xff] %v1400_v26 }
 0x6ef PF: > { %s1567_s9 = sshll.u32 %s1888_s25, 10  ;;  %s1423_s15 = sshll.u32 %s2056_s7, 4  ;;  %s2498_s15 = int_to_ptr.vmem [resolvable:$true] %s1423_s15 }
 0x6f0   : > { %s2495_s10 = scalar_lea.hbm %s2557_s6, %s1567_s9  ;;  %s1410_s30 = scalar_lea.sflag [#allocation8], %s2046_s27 }
 0x6f1   : > { %s1804_s18 = scalar_lea.vmem %s2498_s15, 1024  ;;  %s1911_s20 = smov [#allocation9]  }
 0x6f2   : > { %p1805_p1 = scmp.ne.s32.totalorder %s2498_s15, %s1804_s18  ;;  %s1808_s8 = sshll.u32 %s1911_s20, 4  ;;  %s1809_s8 = int_to_ptr.vmem [resolvable:$false] %s1808_s8 }
 0x6f3   : > { %s1810_s25 = scalar_lea.vmem %s1809_s8, 2048  ;;  %p1811_p6 = scmp.lt.s32.totalorder %s2498_s15, %s1809_s8 }
 0x6f4   : > { %p1806_p4 = pnand %p1805_p1, %p2012_p10  ;;  %p1812_p7 = scmp.lt.s32.totalorder %s1810_s25, %s1804_s18 }
 0x6f6   : > { %p1807_p5 = pneg %p1806_p4  ;;  %p1813_p8 = por %p1812_p7, %p1811_p6 }
 0x6f8   : > { %p1814_p12 = pnand %p1813_p8, %p1807_p5 }
 0x6fa   : > { %1817 = shalt.err (!%p1814_p12)
}
 0x6fb   : > { %s1818_s7 = scalar_lea.hbm %s2495_s10, 1024  ;;  %s1822_s29 = scalar_lea.hbm %s2557_s6, 2048 }
 0x6fc   : > { %p1819_p3 = scmp.ne.s32.totalorder %s2495_s10, %s1818_s7  ;;  %p1823_p0 = scmp.lt.s32.totalorder %s2495_s10, %s2557_s6 }
 0x6fd   : > { %p1824_p9 = scmp.lt.s32.totalorder %s1822_s29, %s1818_s7 }
 0x6fe   : > { %p1820_p13 = pnand %p1819_p3, %p2012_p10 }
 0x6ff   : > { %p1825_p1 = por %p1824_p9, %p1823_p0 }
 0x700   : > { %p1821_p2 = pneg %p1820_p13 }
 0x702   : > { %p1826_p4 = pnand %p1825_p1, %p1821_p2 }
 0x704   : > { %1829 = shalt.err (!%p1826_p4)
}
 0x705   : > { %s1912_s19 = smov 256   ;;  %s1913_s17 = smov 16  }
 0x706   : > { %1580 = dma.vmem_to_hbm [thread:$0]  (%p2012_p10), %s2498_s15, 1024, %s2495_s10, %s1410_s30, %s1912_s19, %s1912_s19, %s1913_s17  }
 0x707 PF: > { %p1591_p5 = scmp.ge.s32.totalorder %s1900_s28, 2  ;;  %s1438_s18 = sand.u32 1, %s1872_s21  }
 0x708   : > { %s1439_s20 = scalar_lea.sflag [#allocation8], %s1438_s18 }
 0x709   : > { %p1587_p6 = pnand %p1591_p5, %p2018_p11 }
 0x70b   : > { %p1588_p7 = pneg %p1587_p6 }
 0x70d   : > { %1867 = dma.done.wait (%p1588_p7), %s1439_s20, 1024  }
 0x70e   : > { %1869 = vsyncadd (%p1588_p7), %s1439_s20, 4294966272  ;;  %s22_s28 = sadd.s32 1, %s1900_s28   ;;  %s2568_s25 = sld [smem:[#allocation12_spill]] }
 0x70f   : > { %p19_p8 = scmp.ge.s32.totalorder %s22_s28, 6   ;;  %s2569_s12 = sld [smem:[#allocation13_spill]] }
 0x710   : > { %s2570_s27 = sld [smem:[#allocation14_spill]]  ;;  %s2571_s21 = smov %s1876_s22 }
 0x711   : > { %s2572_s22 = smov %s1880_s23  ;;  %s2573_s23 = smov %s2025_s16 }
 0x712   : > { %s2574_s24 = smov %s1892_s26  ;;  %21 = sbr.rel (!%p19_p8) target bundleno = 7 (0x7), region = 99 }
 0x715   : > { %s2575_s26 = smov %s2569_s12 }
 0x717   :  { %1444 = vsyncpa [#allocation7], 1 }
 0x718   :  { %1446 = vsyncpa [#allocation7 + $0x1], 1 }
 0x719   :  { %1447 = vsyncpa [#allocation8], 1 }
 0x71a   :  { %1449 = vsyncpa [#allocation8 + $0x1], 1 }

</bundles_post_ra>
